<compile_context>
chip_gen: v5e
topology: v5e:2x2
jax: 0.10.0
libtpu: 0.0.40
codegen_flags: <defaults>
</compile_context>

<pallas_src>
import jax
import jax.numpy as jnp
from jax.experimental import pallas as pl
from jax.experimental.pallas import tpu as pltpu

NEG_SLOPE = 0.01                 # nn.LeakyReLU default negative_slope
BN_EPS = 1e-5                    # nn.BatchNorm1d default eps
MAX_K = 15
HALO = (MAX_K - 1) // 2          # 7 ('same' halo of the widest kernel)
MAX_TILE = 512                   # conv-output positions per grid step


def _leaky(y):
    return jnp.where(y >= 0.0, y, NEG_SLOPE * y)


def _residual_cnn_kernel(xe_ref, xo_ref, w_ref, scale_ref, shift_ref, out_ref):
    """One (batch, L-tile) grid step.

    xe_ref / xo_ref : (Cin, n + 8) bf16 -- even / odd columns of the
                      zero-padded input window covering this tile.
    w_ref           : (15, 2*C4, Cin) bf16 -- fused multi-scale + residual taps.
    scale/shift_ref : (2*C4, 1) f32 -- folded conv-bias + BN affine + 0.5 pool.
    out_ref         : (C4, n) f32 -- AvgPool1d(2) output tile (n pooled cols).
    """
    C4, n = out_ref.shape
    C2 = w_ref.shape[1]
    xe = xe_ref[...]
    xo = xo_ref[...]

    f32 = jnp.float32
    acc_e = jnp.zeros((C2, n), f32)      # conv output at even positions
    acc_o = jnp.zeros((C2, n), f32)      # conv output at odd positions
    # 15-tap 'same' conv split into even/odd output phases:
    #   c_even[i] = sum_a w[2a]   @ xe[i+a]    (a = 0..7)
    #             + sum_a w[2a+1] @ xo[i+a]    (a = 0..6)
    #   c_odd[i]  = sum_a w[2a]   @ xo[i+a]    (a = 0..7)
    #             + sum_a w[2a+1] @ xe[i+a+1]  (a = 0..6)
    for s in range(8):                   # static unroll; 30 MXU matmuls total
        xe_s = xe[:, s:s + n]            # small lane-shifted window
        xo_s = xo[:, s:s + n]
        w_even = w_ref[2 * s]            # (2*C4, Cin), static index
        acc_e = acc_e + jnp.dot(w_even, xe_s, preferred_element_type=f32)
        acc_o = acc_o + jnp.dot(w_even, xo_s, preferred_element_type=f32)
        if s < 7:
            acc_e = acc_e + jnp.dot(w_ref[2 * s + 1], xo_s,
                                    preferred_element_type=f32)
        if s > 0:
            acc_o = acc_o + jnp.dot(w_ref[2 * s - 1], xe_s,
                                    preferred_element_type=f32)

    scale = scale_ref[...]               # already carries the 0.5 pool factor
    shift = shift_ref[...]
    act_e = _leaky(acc_e * scale + shift)        # (2*C4, n)
    act_o = _leaky(acc_o * scale + shift)
    # rows [0, C4) = multi-scale concat branch, rows [C4, 2*C4) = residual.
    tot = (act_e[:C4] + act_e[C4:]) + (act_o[:C4] + act_o[C4:])
    out_ref[...] = tot.astype(out_ref.dtype)     # AvgPool1d(2) (0.5 pre-folded)


def residual_cnn_block(x_ncl, params):
    """x_ncl: (B, Cin, L) f32 -> (B, 4*out_channels, L // 2) f32 (eval mode)."""
    B, Cin, L = x_ncl.shape
    w = params["w_kco"]                       # (15, 2*C4, Cin) f32
    C2 = w.shape[1]
    C4 = C2 // 2
    Lh = L // 2

    Lt = min(MAX_TILE, ((L + 1) // 2) * 2)    # even tile of conv positions
    NL = pl.cdiv(L, Lt)
    L_round = NL * Lt
    n = Lt // 2                               # pooled columns per tile
    W = n + 8                                 # deinterleaved window width

    # zero-pad: 7-col 'same' halo left, (round-up + halo + spare) right.
    xp = jnp.pad(x_ncl, ((0, 0), (0, 0), (HALO, L_round - L + HALO + 2)))
    xe_g = xp[:, :, 0::2]                     # (B, Cin, L_round//2 + 8)
    xo_g = xp[:, :, 1::2]
    # Overlapping per-tile windows (stride n, width n+8) -> (B, NL, Cin, W).
    idx = (jnp.arange(NL) * n)[:, None] + jnp.arange(W)[None, :]
    xe_t = jnp.transpose(xe_g[:, :, idx], (0, 2, 1, 3)).astype(jnp.bfloat16)
    xo_t = jnp.transpose(xo_g[:, :, idx], (0, 2, 1, 3)).astype(jnp.bfloat16)

    w_bf = w.astype(jnp.bfloat16)
    # Fold the AvgPool1d(2) 0.5 factor into scale/shift (leaky is pos.-homog.).
    scale = 0.5 * params["scale"]             # (2*C4, 1) f32
    shift = 0.5 * params["shift"]             # (2*C4, 1) f32

    out = pl.pallas_call(
        _residual_cnn_kernel,
        out_shape=jax.ShapeDtypeStruct((B, C4, NL * n), jnp.float32),
        grid_spec=pltpu.PrefetchScalarGridSpec(
            num_scalar_prefetch=0,
            grid=(B, NL),
            in_specs=[
                pl.BlockSpec((None, None, Cin, W), lambda b, l: (b, l, 0, 0)),
                pl.BlockSpec((None, None, Cin, W), lambda b, l: (b, l, 0, 0)),
                pl.BlockSpec(w_bf.shape, lambda b, l: (0, 0, 0)),
                pl.BlockSpec(scale.shape, lambda b, l: (0, 0)),
                pl.BlockSpec(shift.shape, lambda b, l: (0, 0)),
            ],
            out_specs=pl.BlockSpec((None, C4, n), lambda b, l: (b, 0, l)),
        ),
        compiler_params=pltpu.CompilerParams(
            dimension_semantics=("parallel", "parallel")),
    )(xe_t, xo_t, w_bf, scale, shift)

    return out[:, :, :Lh]


# ------------------------- parameter construction ---------------------------

def _conv_layer_params(it, cin, cout, K):
    """PyTorch-layout ConvolutionLayer params (Conv1d + BatchNorm1d)."""
    w = jax.random.normal(next(it), (cout, cin, K), jnp.float32) / jnp.sqrt(
        jnp.float32(cin * K))
    b = 0.1 * jax.random.normal(next(it), (cout,), jnp.float32)
    gamma = 1.0 + 0.1 * jax.random.normal(next(it), (cout,), jnp.float32)
    beta = 0.1 * jax.random.normal(next(it), (cout,), jnp.float32)
    mean = 0.1 * jax.random.normal(next(it), (cout,), jnp.float32)
    var = jnp.abs(jax.random.normal(next(it), (cout,), jnp.float32)) + 0.5
    return dict(w=w, b=b, gamma=gamma, beta=beta, mean=mean, var=var)


def _fold_bn(layer):
    scale = layer["gamma"] / jnp.sqrt(layer["var"] + BN_EPS)
    shift = layer["beta"] + scale * (layer["b"] - layer["mean"])
    return scale, shift


def init_params(key, in_channels, out_channels):
    C4 = out_channels * 4
    C2 = 2 * C4
    keys = iter(jax.random.split(key, 64))

    raw = {
        "res": _conv_layer_params(keys, in_channels, C4, 5),
        "k3": _conv_layer_params(keys, in_channels, out_channels, 3),
        "k5": _conv_layer_params(keys, in_channels, out_channels, 5),
        "k9": _conv_layer_params(keys, in_channels, out_channels, 9),
        "k15": _conv_layer_params(keys, in_channels, out_channels, 15),
    }
    # The kernel multiplies in bf16; make the reference use the identical
    # bf16-representable conv weights so the check isolates structural errors.
    for name in raw:
        raw[name]["w"] = raw[name]["w"].astype(jnp.bfloat16).astype(jnp.float32)

    # Pack all branches into one centered 15-tap weight (15, 2*C4, Cin):
    # output rows [0, C4) = multi-scale concat (k3, k5, k9, k15),
    # output rows [C4, 2*C4) = residual conv (K=5).
    w_packed = jnp.zeros((MAX_K, C2, in_channels), jnp.float32)
    scales, shifts = [], []
    for i, K in enumerate((3, 5, 9, 15)):
        lay = raw[f"k{K}"]
        off = (MAX_K - K) // 2
        w_koi = jnp.transpose(lay["w"], (2, 0, 1))          # (K, Cout, Cin)
        w_packed = w_packed.at[
            off:off + K, i * out_channels:(i + 1) * out_channels, :].set(w_koi)
        s, b = _fold_bn(lay)
        scales.append(s)
        shifts.append(b)
    lay = raw["res"]
    off = (MAX_K - 5) // 2
    w_packed = w_packed.at[off:off + 5, C4:, :].set(
        jnp.transpose(lay["w"], (2, 0, 1)))
    s, b = _fold_bn(lay)
    scales.append(s)
    shifts.append(b)

    params = {
        "w_kco": w_packed,
        "scale": jnp.concatenate(scales).reshape(C2, 1),
        "shift": jnp.concatenate(shifts).reshape(C2, 1),
    }
    return params, raw


# ----------------------------- pure-JAX reference ---------------------------

def ref_forward(x_ncl, raw):
    def conv_layer(x, lay):
        K = lay["w"].shape[-1]
        pad = (K - 1) // 2
        y = jax.lax.conv_general_dilated(
            x, lay["w"], window_strides=(1,), padding=[(pad, pad)],
            dimension_numbers=("NCH", "OIH", "NCH"))
        y = y + lay["b"][None, :, None]
        y = (y - lay["mean"][None, :, None]) / jnp.sqrt(
            lay["var"][None, :, None] + BN_EPS)
        y = y * lay["gamma"][None, :, None] + lay["beta"][None, :, None]
        return jnp.where(y >= 0.0, y, NEG_SLOPE * y)

    res = conv_layer(x_ncl, raw["res"])
    ms = jnp.concatenate(
        [conv_layer(x_ncl, raw[f"k{K}"]) for K in (3, 5, 9, 15)], axis=1)
    r = ms + res
    Lh = r.shape[-1] // 2
    return 0.5 * (r[..., 0:2 * Lh:2] + r[..., 1:2 * Lh:2])   # AvgPool1d(2)


# ------------------------------------ main -----------------------------------

if __name__ == "__main__":
    B, IN_CH, OUT_CH, L = 2, 4, 4, 16

    root = jax.random.PRNGKey(0)
    k_params, k_x = jax.random.split(root)
    params, raw = init_params(k_params, IN_CH, OUT_CH)
    x = jax.random.normal(k_x, (B, IN_CH, L), jnp.float32)
    # Round inputs to bf16-representable values (the kernel feeds the MXU in
    # bf16) so the f32 reference check only measures kernel-structure error.
    x = x.astype(jnp.bfloat16).astype(jnp.float32)

    out = jax.block_until_ready(residual_cnn_block(x, params))
    expected = jax.block_until_ready(ref_forward(x, raw))

    assert out.shape == (B, OUT_CH * 4, L // 2), out.shape
    max_err = float(jnp.max(jnp.abs(out - expected)))
    assert jnp.allclose(out, expected, atol=2e-3, rtol=2e-3), max_err

    print("KERNEL_OK")
</pallas_src>

<mosaic_0001>
module attributes {stable_mosaic.version = 11 : i64} {
  func.func @_residual_cnn_kernel(%arg0: i32, %arg1: i32, %arg2: memref<1x1x4x16xbf16, #tpu.memory_space<vmem>>, %arg3: memref<1x1x4x16xbf16, #tpu.memory_space<vmem>>, %arg4: memref<15x32x4xbf16, #tpu.memory_space<vmem>>, %arg5: memref<32x1xf32, #tpu.memory_space<vmem>>, %arg6: memref<32x1xf32, #tpu.memory_space<vmem>>, %arg7: memref<1x16x8xf32, #tpu.memory_space<vmem>>) attributes {dimension_semantics = [#tpu.dimension_semantics<parallel>, #tpu.dimension_semantics<parallel>], iteration_bounds = array<i64: 2, 1>, scalar_prefetch = 0 : i64, scratch_operands = 0 : i64, tpu.core_type = #tpu.core_type<tc>, window_params = [{transform_indices = @transform_0, window_bounds = array<i64: 1, 1, 4, 16>}, {transform_indices = @transform_1, window_bounds = array<i64: 1, 1, 4, 16>}, {pipeline_mode = #tpu.pipeline_mode<synchronous>, transform_indices = @transform_2, window_bounds = array<i64: 15, 32, 4>}, {pipeline_mode = #tpu.pipeline_mode<synchronous>, transform_indices = @transform_3, window_bounds = array<i64: 32, 1>}, {pipeline_mode = #tpu.pipeline_mode<synchronous>, transform_indices = @transform_4, window_bounds = array<i64: 32, 1>}, {transform_indices = @transform_5, window_bounds = array<i64: 1, 16, 8>}]} {
    %c0 = arith.constant 0 : index
    %c0_0 = arith.constant 0 : index
    %c0_1 = arith.constant 0 : index
    %c0_2 = arith.constant 0 : index
    %0 = vector.load %arg2[%c0, %c0_0, %c0_1, %c0_2] : memref<1x1x4x16xbf16, #tpu.memory_space<vmem>>, vector<1x1x4x16xbf16>
    %1 = vector.shape_cast %0 : vector<1x1x4x16xbf16> to vector<4x16xbf16>
    %c0_3 = arith.constant 0 : index
    %c0_4 = arith.constant 0 : index
    %c0_5 = arith.constant 0 : index
    %c0_6 = arith.constant 0 : index
    %2 = vector.load %arg3[%c0_3, %c0_4, %c0_5, %c0_6] : memref<1x1x4x16xbf16, #tpu.memory_space<vmem>>, vector<1x1x4x16xbf16>
    %3 = vector.shape_cast %2 : vector<1x1x4x16xbf16> to vector<4x16xbf16>
    %cst = arith.constant 0.000000e+00 : f32
    %4 = vector.broadcast %cst : f32 to vector<32x8xf32>
    %cst_7 = arith.constant 0.000000e+00 : f32
    %5 = vector.broadcast %cst_7 : f32 to vector<32x8xf32>
    %6 = vector.extract_strided_slice %1 {offsets = [0, 0], sizes = [4, 8], strides = [1, 1]} : vector<4x16xbf16> to vector<4x8xbf16>
    %7 = vector.extract_strided_slice %3 {offsets = [0, 0], sizes = [4, 8], strides = [1, 1]} : vector<4x16xbf16> to vector<4x8xbf16>
    %c0_8 = arith.constant 0 : index
    %c0_9 = arith.constant 0 : index
    %c0_10 = arith.constant 0 : index
    %8 = vector.load %arg4[%c0_8, %c0_9, %c0_10] : memref<15x32x4xbf16, #tpu.memory_space<vmem>>, vector<1x32x4xbf16>
    %9 = vector.shape_cast %8 : vector<1x32x4xbf16> to vector<32x4xbf16>
    %cst_11 = arith.constant dense<0.000000e+00> : vector<32x8xf32>
    %10 = tpu.matmul %9, %6, %cst_11 {dimension_numbers = #tpu.dot_dimension_numbers<[1], [0], [0], [1], [0, 0, 1, 1], [], []>} : vector<32x4xbf16>, vector<4x8xbf16>, vector<32x8xf32> -> vector<32x8xf32>
    %11 = arith.addf %4, %10 : vector<32x8xf32>
    %cst_12 = arith.constant dense<0.000000e+00> : vector<32x8xf32>
    %12 = tpu.matmul %9, %7, %cst_12 {dimension_numbers = #tpu.dot_dimension_numbers<[1], [0], [0], [1], [0, 0, 1, 1], [], []>} : vector<32x4xbf16>, vector<4x8xbf16>, vector<32x8xf32> -> vector<32x8xf32>
    %13 = arith.addf %5, %12 : vector<32x8xf32>
    %c1 = arith.constant 1 : index
    %c0_13 = arith.constant 0 : index
    %c0_14 = arith.constant 0 : index
    %14 = vector.load %arg4[%c1, %c0_13, %c0_14] : memref<15x32x4xbf16, #tpu.memory_space<vmem>>, vector<1x32x4xbf16>
    %15 = vector.shape_cast %14 : vector<1x32x4xbf16> to vector<32x4xbf16>
    %cst_15 = arith.constant dense<0.000000e+00> : vector<32x8xf32>
    %16 = tpu.matmul %15, %7, %cst_15 {dimension_numbers = #tpu.dot_dimension_numbers<[1], [0], [0], [1], [0, 0, 1, 1], [], []>} : vector<32x4xbf16>, vector<4x8xbf16>, vector<32x8xf32> -> vector<32x8xf32>
    %17 = arith.addf %11, %16 : vector<32x8xf32>
    %18 = vector.extract_strided_slice %1 {offsets = [0, 1], sizes = [4, 8], strides = [1, 1]} : vector<4x16xbf16> to vector<4x8xbf16>
    %19 = vector.extract_strided_slice %3 {offsets = [0, 1], sizes = [4, 8], strides = [1, 1]} : vector<4x16xbf16> to vector<4x8xbf16>
    %c2 = arith.constant 2 : index
    %c0_16 = arith.constant 0 : index
    %c0_17 = arith.constant 0 : index
    %20 = vector.load %arg4[%c2, %c0_16, %c0_17] : memref<15x32x4xbf16, #tpu.memory_space<vmem>>, vector<1x32x4xbf16>
    %21 = vector.shape_cast %20 : vector<1x32x4xbf16> to vector<32x4xbf16>
    %cst_18 = arith.constant dense<0.000000e+00> : vector<32x8xf32>
    %22 = tpu.matmul %21, %18, %cst_18 {dimension_numbers = #tpu.dot_dimension_numbers<[1], [0], [0], [1], [0, 0, 1, 1], [], []>} : vector<32x4xbf16>, vector<4x8xbf16>, vector<32x8xf32> -> vector<32x8xf32>
    %23 = arith.addf %17, %22 : vector<32x8xf32>
    %cst_19 = arith.constant dense<0.000000e+00> : vector<32x8xf32>
    %24 = tpu.matmul %21, %19, %cst_19 {dimension_numbers = #tpu.dot_dimension_numbers<[1], [0], [0], [1], [0, 0, 1, 1], [], []>} : vector<32x4xbf16>, vector<4x8xbf16>, vector<32x8xf32> -> vector<32x8xf32>
    %25 = arith.addf %13, %24 : vector<32x8xf32>
    %c3 = arith.constant 3 : index
    %c0_20 = arith.constant 0 : index
    %c0_21 = arith.constant 0 : index
    %26 = vector.load %arg4[%c3, %c0_20, %c0_21] : memref<15x32x4xbf16, #tpu.memory_space<vmem>>, vector<1x32x4xbf16>
    %27 = vector.shape_cast %26 : vector<1x32x4xbf16> to vector<32x4xbf16>
    %cst_22 = arith.constant dense<0.000000e+00> : vector<32x8xf32>
    %28 = tpu.matmul %27, %19, %cst_22 {dimension_numbers = #tpu.dot_dimension_numbers<[1], [0], [0], [1], [0, 0, 1, 1], [], []>} : vector<32x4xbf16>, vector<4x8xbf16>, vector<32x8xf32> -> vector<32x8xf32>
    %29 = arith.addf %23, %28 : vector<32x8xf32>
    %c1_23 = arith.constant 1 : index
    %c0_24 = arith.constant 0 : index
    %c0_25 = arith.constant 0 : index
    %30 = vector.load %arg4[%c1_23, %c0_24, %c0_25] : memref<15x32x4xbf16, #tpu.memory_space<vmem>>, vector<1x32x4xbf16>
    %31 = vector.shape_cast %30 : vector<1x32x4xbf16> to vector<32x4xbf16>
    %cst_26 = arith.constant dense<0.000000e+00> : vector<32x8xf32>
    %32 = tpu.matmul %31, %18, %cst_26 {dimension_numbers = #tpu.dot_dimension_numbers<[1], [0], [0], [1], [0, 0, 1, 1], [], []>} : vector<32x4xbf16>, vector<4x8xbf16>, vector<32x8xf32> -> vector<32x8xf32>
    %33 = arith.addf %25, %32 : vector<32x8xf32>
    %34 = vector.extract_strided_slice %1 {offsets = [0, 2], sizes = [4, 8], strides = [1, 1]} : vector<4x16xbf16> to vector<4x8xbf16>
    %35 = vector.extract_strided_slice %3 {offsets = [0, 2], sizes = [4, 8], strides = [1, 1]} : vector<4x16xbf16> to vector<4x8xbf16>
    %c4 = arith.constant 4 : index
    %c0_27 = arith.constant 0 : index
    %c0_28 = arith.constant 0 : index
    %36 = vector.load %arg4[%c4, %c0_27, %c0_28] : memref<15x32x4xbf16, #tpu.memory_space<vmem>>, vector<1x32x4xbf16>
    %37 = vector.shape_cast %36 : vector<1x32x4xbf16> to vector<32x4xbf16>
    %cst_29 = arith.constant dense<0.000000e+00> : vector<32x8xf32>
    %38 = tpu.matmul %37, %34, %cst_29 {dimension_numbers = #tpu.dot_dimension_numbers<[1], [0], [0], [1], [0, 0, 1, 1], [], []>} : vector<32x4xbf16>, vector<4x8xbf16>, vector<32x8xf32> -> vector<32x8xf32>
    %39 = arith.addf %29, %38 : vector<32x8xf32>
    %cst_30 = arith.constant dense<0.000000e+00> : vector<32x8xf32>
    %40 = tpu.matmul %37, %35, %cst_30 {dimension_numbers = #tpu.dot_dimension_numbers<[1], [0], [0], [1], [0, 0, 1, 1], [], []>} : vector<32x4xbf16>, vector<4x8xbf16>, vector<32x8xf32> -> vector<32x8xf32>
    %41 = arith.addf %33, %40 : vector<32x8xf32>
    %c5 = arith.constant 5 : index
    %c0_31 = arith.constant 0 : index
    %c0_32 = arith.constant 0 : index
    %42 = vector.load %arg4[%c5, %c0_31, %c0_32] : memref<15x32x4xbf16, #tpu.memory_space<vmem>>, vector<1x32x4xbf16>
    %43 = vector.shape_cast %42 : vector<1x32x4xbf16> to vector<32x4xbf16>
    %cst_33 = arith.constant dense<0.000000e+00> : vector<32x8xf32>
    %44 = tpu.matmul %43, %35, %cst_33 {dimension_numbers = #tpu.dot_dimension_numbers<[1], [0], [0], [1], [0, 0, 1, 1], [], []>} : vector<32x4xbf16>, vector<4x8xbf16>, vector<32x8xf32> -> vector<32x8xf32>
    %45 = arith.addf %39, %44 : vector<32x8xf32>
    %c3_34 = arith.constant 3 : index
    %c0_35 = arith.constant 0 : index
    %c0_36 = arith.constant 0 : index
    %46 = vector.load %arg4[%c3_34, %c0_35, %c0_36] : memref<15x32x4xbf16, #tpu.memory_space<vmem>>, vector<1x32x4xbf16>
    %47 = vector.shape_cast %46 : vector<1x32x4xbf16> to vector<32x4xbf16>
    %cst_37 = arith.constant dense<0.000000e+00> : vector<32x8xf32>
    %48 = tpu.matmul %47, %34, %cst_37 {dimension_numbers = #tpu.dot_dimension_numbers<[1], [0], [0], [1], [0, 0, 1, 1], [], []>} : vector<32x4xbf16>, vector<4x8xbf16>, vector<32x8xf32> -> vector<32x8xf32>
    %49 = arith.addf %41, %48 : vector<32x8xf32>
    %50 = vector.extract_strided_slice %1 {offsets = [0, 3], sizes = [4, 8], strides = [1, 1]} : vector<4x16xbf16> to vector<4x8xbf16>
    %51 = vector.extract_strided_slice %3 {offsets = [0, 3], sizes = [4, 8], strides = [1, 1]} : vector<4x16xbf16> to vector<4x8xbf16>
    %c6 = arith.constant 6 : index
    %c0_38 = arith.constant 0 : index
    %c0_39 = arith.constant 0 : index
    %52 = vector.load %arg4[%c6, %c0_38, %c0_39] : memref<15x32x4xbf16, #tpu.memory_space<vmem>>, vector<1x32x4xbf16>
    %53 = vector.shape_cast %52 : vector<1x32x4xbf16> to vector<32x4xbf16>
    %cst_40 = arith.constant dense<0.000000e+00> : vector<32x8xf32>
    %54 = tpu.matmul %53, %50, %cst_40 {dimension_numbers = #tpu.dot_dimension_numbers<[1], [0], [0], [1], [0, 0, 1, 1], [], []>} : vector<32x4xbf16>, vector<4x8xbf16>, vector<32x8xf32> -> vector<32x8xf32>
    %55 = arith.addf %45, %54 : vector<32x8xf32>
    %cst_41 = arith.constant dense<0.000000e+00> : vector<32x8xf32>
    %56 = tpu.matmul %53, %51, %cst_41 {dimension_numbers = #tpu.dot_dimension_numbers<[1], [0], [0], [1], [0, 0, 1, 1], [], []>} : vector<32x4xbf16>, vector<4x8xbf16>, vector<32x8xf32> -> vector<32x8xf32>
    %57 = arith.addf %49, %56 : vector<32x8xf32>
    %c7 = arith.constant 7 : index
    %c0_42 = arith.constant 0 : index
    %c0_43 = arith.constant 0 : index
    %58 = vector.load %arg4[%c7, %c0_42, %c0_43] : memref<15x32x4xbf16, #tpu.memory_space<vmem>>, vector<1x32x4xbf16>
    %59 = vector.shape_cast %58 : vector<1x32x4xbf16> to vector<32x4xbf16>
    %cst_44 = arith.constant dense<0.000000e+00> : vector<32x8xf32>
    %60 = tpu.matmul %59, %51, %cst_44 {dimension_numbers = #tpu.dot_dimension_numbers<[1], [0], [0], [1], [0, 0, 1, 1], [], []>} : vector<32x4xbf16>, vector<4x8xbf16>, vector<32x8xf32> -> vector<32x8xf32>
    %61 = arith.addf %55, %60 : vector<32x8xf32>
    %c5_45 = arith.constant 5 : index
    %c0_46 = arith.constant 0 : index
    %c0_47 = arith.constant 0 : index
    %62 = vector.load %arg4[%c5_45, %c0_46, %c0_47] : memref<15x32x4xbf16, #tpu.memory_space<vmem>>, vector<1x32x4xbf16>
    %63 = vector.shape_cast %62 : vector<1x32x4xbf16> to vector<32x4xbf16>
    %cst_48 = arith.constant dense<0.000000e+00> : vector<32x8xf32>
    %64 = tpu.matmul %63, %50, %cst_48 {dimension_numbers = #tpu.dot_dimension_numbers<[1], [0], [0], [1], [0, 0, 1, 1], [], []>} : vector<32x4xbf16>, vector<4x8xbf16>, vector<32x8xf32> -> vector<32x8xf32>
    %65 = arith.addf %57, %64 : vector<32x8xf32>
    %66 = vector.extract_strided_slice %1 {offsets = [0, 4], sizes = [4, 8], strides = [1, 1]} : vector<4x16xbf16> to vector<4x8xbf16>
    %67 = vector.extract_strided_slice %3 {offsets = [0, 4], sizes = [4, 8], strides = [1, 1]} : vector<4x16xbf16> to vector<4x8xbf16>
    %c8 = arith.constant 8 : index
    %c0_49 = arith.constant 0 : index
    %c0_50 = arith.constant 0 : index
    %68 = vector.load %arg4[%c8, %c0_49, %c0_50] : memref<15x32x4xbf16, #tpu.memory_space<vmem>>, vector<1x32x4xbf16>
    %69 = vector.shape_cast %68 : vector<1x32x4xbf16> to vector<32x4xbf16>
    %cst_51 = arith.constant dense<0.000000e+00> : vector<32x8xf32>
    %70 = tpu.matmul %69, %66, %cst_51 {dimension_numbers = #tpu.dot_dimension_numbers<[1], [0], [0], [1], [0, 0, 1, 1], [], []>} : vector<32x4xbf16>, vector<4x8xbf16>, vector<32x8xf32> -> vector<32x8xf32>
    %71 = arith.addf %61, %70 : vector<32x8xf32>
    %cst_52 = arith.constant dense<0.000000e+00> : vector<32x8xf32>
    %72 = tpu.matmul %69, %67, %cst_52 {dimension_numbers = #tpu.dot_dimension_numbers<[1], [0], [0], [1], [0, 0, 1, 1], [], []>} : vector<32x4xbf16>, vector<4x8xbf16>, vector<32x8xf32> -> vector<32x8xf32>
    %73 = arith.addf %65, %72 : vector<32x8xf32>
    %c9 = arith.constant 9 : index
    %c0_53 = arith.constant 0 : index
    %c0_54 = arith.constant 0 : index
    %74 = vector.load %arg4[%c9, %c0_53, %c0_54] : memref<15x32x4xbf16, #tpu.memory_space<vmem>>, vector<1x32x4xbf16>
    %75 = vector.shape_cast %74 : vector<1x32x4xbf16> to vector<32x4xbf16>
    %cst_55 = arith.constant dense<0.000000e+00> : vector<32x8xf32>
    %76 = tpu.matmul %75, %67, %cst_55 {dimension_numbers = #tpu.dot_dimension_numbers<[1], [0], [0], [1], [0, 0, 1, 1], [], []>} : vector<32x4xbf16>, vector<4x8xbf16>, vector<32x8xf32> -> vector<32x8xf32>
    %77 = arith.addf %71, %76 : vector<32x8xf32>
    %c7_56 = arith.constant 7 : index
    %c0_57 = arith.constant 0 : index
    %c0_58 = arith.constant 0 : index
    %78 = vector.load %arg4[%c7_56, %c0_57, %c0_58] : memref<15x32x4xbf16, #tpu.memory_space<vmem>>, vector<1x32x4xbf16>
    %79 = vector.shape_cast %78 : vector<1x32x4xbf16> to vector<32x4xbf16>
    %cst_59 = arith.constant dense<0.000000e+00> : vector<32x8xf32>
    %80 = tpu.matmul %79, %66, %cst_59 {dimension_numbers = #tpu.dot_dimension_numbers<[1], [0], [0], [1], [0, 0, 1, 1], [], []>} : vector<32x4xbf16>, vector<4x8xbf16>, vector<32x8xf32> -> vector<32x8xf32>
    %81 = arith.addf %73, %80 : vector<32x8xf32>
    %82 = vector.extract_strided_slice %1 {offsets = [0, 5], sizes = [4, 8], strides = [1, 1]} : vector<4x16xbf16> to vector<4x8xbf16>
    %83 = vector.extract_strided_slice %3 {offsets = [0, 5], sizes = [4, 8], strides = [1, 1]} : vector<4x16xbf16> to vector<4x8xbf16>
    %c10 = arith.constant 10 : index
    %c0_60 = arith.constant 0 : index
    %c0_61 = arith.constant 0 : index
    %84 = vector.load %arg4[%c10, %c0_60, %c0_61] : memref<15x32x4xbf16, #tpu.memory_space<vmem>>, vector<1x32x4xbf16>
    %85 = vector.shape_cast %84 : vector<1x32x4xbf16> to vector<32x4xbf16>
    %cst_62 = arith.constant dense<0.000000e+00> : vector<32x8xf32>
    %86 = tpu.matmul %85, %82, %cst_62 {dimension_numbers = #tpu.dot_dimension_numbers<[1], [0], [0], [1], [0, 0, 1, 1], [], []>} : vector<32x4xbf16>, vector<4x8xbf16>, vector<32x8xf32> -> vector<32x8xf32>
    %87 = arith.addf %77, %86 : vector<32x8xf32>
    %cst_63 = arith.constant dense<0.000000e+00> : vector<32x8xf32>
    %88 = tpu.matmul %85, %83, %cst_63 {dimension_numbers = #tpu.dot_dimension_numbers<[1], [0], [0], [1], [0, 0, 1, 1], [], []>} : vector<32x4xbf16>, vector<4x8xbf16>, vector<32x8xf32> -> vector<32x8xf32>
    %89 = arith.addf %81, %88 : vector<32x8xf32>
    %c11 = arith.constant 11 : index
    %c0_64 = arith.constant 0 : index
    %c0_65 = arith.constant 0 : index
    %90 = vector.load %arg4[%c11, %c0_64, %c0_65] : memref<15x32x4xbf16, #tpu.memory_space<vmem>>, vector<1x32x4xbf16>
    %91 = vector.shape_cast %90 : vector<1x32x4xbf16> to vector<32x4xbf16>
    %cst_66 = arith.constant dense<0.000000e+00> : vector<32x8xf32>
    %92 = tpu.matmul %91, %83, %cst_66 {dimension_numbers = #tpu.dot_dimension_numbers<[1], [0], [0], [1], [0, 0, 1, 1], [], []>} : vector<32x4xbf16>, vector<4x8xbf16>, vector<32x8xf32> -> vector<32x8xf32>
    %93 = arith.addf %87, %92 : vector<32x8xf32>
    %c9_67 = arith.constant 9 : index
    %c0_68 = arith.constant 0 : index
    %c0_69 = arith.constant 0 : index
    %94 = vector.load %arg4[%c9_67, %c0_68, %c0_69] : memref<15x32x4xbf16, #tpu.memory_space<vmem>>, vector<1x32x4xbf16>
    %95 = vector.shape_cast %94 : vector<1x32x4xbf16> to vector<32x4xbf16>
    %cst_70 = arith.constant dense<0.000000e+00> : vector<32x8xf32>
    %96 = tpu.matmul %95, %82, %cst_70 {dimension_numbers = #tpu.dot_dimension_numbers<[1], [0], [0], [1], [0, 0, 1, 1], [], []>} : vector<32x4xbf16>, vector<4x8xbf16>, vector<32x8xf32> -> vector<32x8xf32>
    %97 = arith.addf %89, %96 : vector<32x8xf32>
    %98 = vector.extract_strided_slice %1 {offsets = [0, 6], sizes = [4, 8], strides = [1, 1]} : vector<4x16xbf16> to vector<4x8xbf16>
    %99 = vector.extract_strided_slice %3 {offsets = [0, 6], sizes = [4, 8], strides = [1, 1]} : vector<4x16xbf16> to vector<4x8xbf16>
    %c12 = arith.constant 12 : index
    %c0_71 = arith.constant 0 : index
    %c0_72 = arith.constant 0 : index
    %100 = vector.load %arg4[%c12, %c0_71, %c0_72] : memref<15x32x4xbf16, #tpu.memory_space<vmem>>, vector<1x32x4xbf16>
    %101 = vector.shape_cast %100 : vector<1x32x4xbf16> to vector<32x4xbf16>
    %cst_73 = arith.constant dense<0.000000e+00> : vector<32x8xf32>
    %102 = tpu.matmul %101, %98, %cst_73 {dimension_numbers = #tpu.dot_dimension_numbers<[1], [0], [0], [1], [0, 0, 1, 1], [], []>} : vector<32x4xbf16>, vector<4x8xbf16>, vector<32x8xf32> -> vector<32x8xf32>
    %103 = arith.addf %93, %102 : vector<32x8xf32>
    %cst_74 = arith.constant dense<0.000000e+00> : vector<32x8xf32>
    %104 = tpu.matmul %101, %99, %cst_74 {dimension_numbers = #tpu.dot_dimension_numbers<[1], [0], [0], [1], [0, 0, 1, 1], [], []>} : vector<32x4xbf16>, vector<4x8xbf16>, vector<32x8xf32> -> vector<32x8xf32>
    %105 = arith.addf %97, %104 : vector<32x8xf32>
    %c13 = arith.constant 13 : index
    %c0_75 = arith.constant 0 : index
    %c0_76 = arith.constant 0 : index
    %106 = vector.load %arg4[%c13, %c0_75, %c0_76] : memref<15x32x4xbf16, #tpu.memory_space<vmem>>, vector<1x32x4xbf16>
    %107 = vector.shape_cast %106 : vector<1x32x4xbf16> to vector<32x4xbf16>
    %cst_77 = arith.constant dense<0.000000e+00> : vector<32x8xf32>
    %108 = tpu.matmul %107, %99, %cst_77 {dimension_numbers = #tpu.dot_dimension_numbers<[1], [0], [0], [1], [0, 0, 1, 1], [], []>} : vector<32x4xbf16>, vector<4x8xbf16>, vector<32x8xf32> -> vector<32x8xf32>
    %109 = arith.addf %103, %108 : vector<32x8xf32>
    %c11_78 = arith.constant 11 : index
    %c0_79 = arith.constant 0 : index
    %c0_80 = arith.constant 0 : index
    %110 = vector.load %arg4[%c11_78, %c0_79, %c0_80] : memref<15x32x4xbf16, #tpu.memory_space<vmem>>, vector<1x32x4xbf16>
    %111 = vector.shape_cast %110 : vector<1x32x4xbf16> to vector<32x4xbf16>
    %cst_81 = arith.constant dense<0.000000e+00> : vector<32x8xf32>
    %112 = tpu.matmul %111, %98, %cst_81 {dimension_numbers = #tpu.dot_dimension_numbers<[1], [0], [0], [1], [0, 0, 1, 1], [], []>} : vector<32x4xbf16>, vector<4x8xbf16>, vector<32x8xf32> -> vector<32x8xf32>
    %113 = arith.addf %105, %112 : vector<32x8xf32>
    %114 = vector.extract_strided_slice %1 {offsets = [0, 7], sizes = [4, 8], strides = [1, 1]} : vector<4x16xbf16> to vector<4x8xbf16>
    %115 = vector.extract_strided_slice %3 {offsets = [0, 7], sizes = [4, 8], strides = [1, 1]} : vector<4x16xbf16> to vector<4x8xbf16>
    %c14 = arith.constant 14 : index
    %c0_82 = arith.constant 0 : index
    %c0_83 = arith.constant 0 : index
    %116 = vector.load %arg4[%c14, %c0_82, %c0_83] : memref<15x32x4xbf16, #tpu.memory_space<vmem>>, vector<1x32x4xbf16>
    %117 = vector.shape_cast %116 : vector<1x32x4xbf16> to vector<32x4xbf16>
    %cst_84 = arith.constant dense<0.000000e+00> : vector<32x8xf32>
    %118 = tpu.matmul %117, %114, %cst_84 {dimension_numbers = #tpu.dot_dimension_numbers<[1], [0], [0], [1], [0, 0, 1, 1], [], []>} : vector<32x4xbf16>, vector<4x8xbf16>, vector<32x8xf32> -> vector<32x8xf32>
    %119 = arith.addf %109, %118 : vector<32x8xf32>
    %cst_85 = arith.constant dense<0.000000e+00> : vector<32x8xf32>
    %120 = tpu.matmul %117, %115, %cst_85 {dimension_numbers = #tpu.dot_dimension_numbers<[1], [0], [0], [1], [0, 0, 1, 1], [], []>} : vector<32x4xbf16>, vector<4x8xbf16>, vector<32x8xf32> -> vector<32x8xf32>
    %121 = arith.addf %113, %120 : vector<32x8xf32>
    %c13_86 = arith.constant 13 : index
    %c0_87 = arith.constant 0 : index
    %c0_88 = arith.constant 0 : index
    %122 = vector.load %arg4[%c13_86, %c0_87, %c0_88] : memref<15x32x4xbf16, #tpu.memory_space<vmem>>, vector<1x32x4xbf16>
    %123 = vector.shape_cast %122 : vector<1x32x4xbf16> to vector<32x4xbf16>
    %cst_89 = arith.constant dense<0.000000e+00> : vector<32x8xf32>
    %124 = tpu.matmul %123, %114, %cst_89 {dimension_numbers = #tpu.dot_dimension_numbers<[1], [0], [0], [1], [0, 0, 1, 1], [], []>} : vector<32x4xbf16>, vector<4x8xbf16>, vector<32x8xf32> -> vector<32x8xf32>
    %125 = arith.addf %121, %124 : vector<32x8xf32>
    %c0_90 = arith.constant 0 : index
    %c0_91 = arith.constant 0 : index
    %126 = vector.load %arg5[%c0_90, %c0_91] : memref<32x1xf32, #tpu.memory_space<vmem>>, vector<32x1xf32>
    %c0_92 = arith.constant 0 : index
    %c0_93 = arith.constant 0 : index
    %127 = vector.load %arg6[%c0_92, %c0_93] : memref<32x1xf32, #tpu.memory_space<vmem>>, vector<32x1xf32>
    %128 = vector.broadcast %126 : vector<32x1xf32> to vector<32x8xf32>
    %129 = arith.mulf %119, %128 : vector<32x8xf32>
    %130 = vector.broadcast %127 : vector<32x1xf32> to vector<32x8xf32>
    %131 = arith.addf %129, %130 : vector<32x8xf32>
    %cst_94 = arith.constant 0.000000e+00 : f32
    %132 = vector.broadcast %cst_94 : f32 to vector<32x8xf32>
    %133 = arith.cmpf oge, %131, %132 : vector<32x8xf32>
    %cst_95 = arith.constant 0.00999999977 : f32
    %134 = vector.broadcast %cst_95 : f32 to vector<32x8xf32>
    %135 = arith.mulf %134, %131 : vector<32x8xf32>
    %136 = arith.select %133, %131, %135 : vector<32x8xi1>, vector<32x8xf32>
    %137 = vector.broadcast %126 : vector<32x1xf32> to vector<32x8xf32>
    %138 = arith.mulf %125, %137 : vector<32x8xf32>
    %139 = vector.broadcast %127 : vector<32x1xf32> to vector<32x8xf32>
    %140 = arith.addf %138, %139 : vector<32x8xf32>
    %cst_96 = arith.constant 0.000000e+00 : f32
    %141 = vector.broadcast %cst_96 : f32 to vector<32x8xf32>
    %142 = arith.cmpf oge, %140, %141 : vector<32x8xf32>
    %cst_97 = arith.constant 0.00999999977 : f32
    %143 = vector.broadcast %cst_97 : f32 to vector<32x8xf32>
    %144 = arith.mulf %143, %140 : vector<32x8xf32>
    %145 = arith.select %142, %140, %144 : vector<32x8xi1>, vector<32x8xf32>
    %146 = vector.extract_strided_slice %136 {offsets = [0, 0], sizes = [16, 8], strides = [1, 1]} : vector<32x8xf32> to vector<16x8xf32>
    %147 = vector.extract_strided_slice %136 {offsets = [16, 0], sizes = [16, 8], strides = [1, 1]} : vector<32x8xf32> to vector<16x8xf32>
    %148 = arith.addf %146, %147 : vector<16x8xf32>
    %149 = vector.extract_strided_slice %145 {offsets = [0, 0], sizes = [16, 8], strides = [1, 1]} : vector<32x8xf32> to vector<16x8xf32>
    %150 = vector.extract_strided_slice %145 {offsets = [16, 0], sizes = [16, 8], strides = [1, 1]} : vector<32x8xf32> to vector<16x8xf32>
    %151 = arith.addf %149, %150 : vector<16x8xf32>
    %152 = arith.addf %148, %151 : vector<16x8xf32>
    %c0_98 = arith.constant 0 : index
    %c0_99 = arith.constant 0 : index
    %c0_100 = arith.constant 0 : index
    %153 = vector.load %arg7[%c0_98, %c0_99, %c0_100] : memref<1x16x8xf32, #tpu.memory_space<vmem>>, vector<1x16x8xf32>
    %154 = vector.shape_cast %153 : vector<1x16x8xf32> to vector<16x8xf32>
    %155 = vector.shape_cast %152 : vector<16x8xf32> to vector<1x16x8xf32>
    tpu.vector_store %arg7[%c0_98, %c0_99, %c0_100], %155 {strides = array<i32>} : memref<1x16x8xf32, #tpu.memory_space<vmem>>, vector<1x16x8xf32>,
    return
  }
  func.func @transform_0(%arg0: i32, %arg1: i32) -> (i32, i32, i32, i32) {
    %c0_i32 = arith.constant 0 : i32
    %c0_i32_0 = arith.constant 0 : i32
    %c0_i32_1 = arith.constant 0 : i32
    return %arg0, %arg1, %c0_i32, %c0_i32_0 : i32, i32, i32, i32
  }
  func.func @transform_1(%arg0: i32, %arg1: i32) -> (i32, i32, i32, i32) {
    %c0_i32 = arith.constant 0 : i32
    %c0_i32_0 = arith.constant 0 : i32
    %c0_i32_1 = arith.constant 0 : i32
    return %arg0, %arg1, %c0_i32, %c0_i32_0 : i32, i32, i32, i32
  }
  func.func @transform_2(%arg0: i32, %arg1: i32) -> (i32, i32, i32) {
    %c0_i32 = arith.constant 0 : i32
    %c0_i32_0 = arith.constant 0 : i32
    %c0_i32_1 = arith.constant 0 : i32
    %c0_i32_2 = arith.constant 0 : i32
    return %c0_i32, %c0_i32_0, %c0_i32_1 : i32, i32, i32
  }
  func.func @transform_3(%arg0: i32, %arg1: i32) -> (i32, i32) {
    %c0_i32 = arith.constant 0 : i32
    %c0_i32_0 = arith.constant 0 : i32
    %c0_i32_1 = arith.constant 0 : i32
    return %c0_i32, %c0_i32_0 : i32, i32
  }
  func.func @transform_4(%arg0: i32, %arg1: i32) -> (i32, i32) {
    %c0_i32 = arith.constant 0 : i32
    %c0_i32_0 = arith.constant 0 : i32
    %c0_i32_1 = arith.constant 0 : i32
    return %c0_i32, %c0_i32_0 : i32, i32
  }
  func.func @transform_5(%arg0: i32, %arg1: i32) -> (i32, i32, i32) {
    %c0_i32 = arith.constant 0 : i32
    %c0_i32_0 = arith.constant 0 : i32
    return %arg0, %c0_i32, %arg1 : i32, i32, i32
  }
}

</mosaic_0001>

<bundles_post_ra>
// kernel: tpu_custom_call.1
= control target key start
LH: loop header
LB: loop body
LE: loop exit
PB: predicated region body
PF: predicated region fallthrough
CT: control target
= control target key end

     0   :  { %s2065_s18 = smov 0   ;;  %s2067_s19 = smov 0   ;;  %s2413_s0 = inlined_call_operand.vmem [shape: bf16[2,1,4,16], index: 0, kind: input, shape index: {}]   ;;  %s2414_s1 = inlined_call_operand.vmem [shape: bf16[2,1,4,16], index: 1, kind: input, shape index: {}]   ;;  %s2415_s2 = inlined_call_operand.vmem [shape: bf16[15,32,4], index: 2, kind: input, shape index: {}]   ;;  %s2416_s3 = inlined_call_operand.vmem [shape: f32[32,1], index: 3, kind: input, shape index: {}]   ;;  %s2417_s4 = inlined_call_operand.vmem [shape: f32[32,1], index: 4, kind: input, shape index: {}]   ;;  %s2418_s5 = inlined_call_operand.vmem [shape: f32[2,16,8], index: 5, kind: output, shape index: {}]  }
   0x1   :  { %s2069_s20 = smov 0  }
   0x2 LB: > { %s27_s21 = sadd.s32 1, %s2021_s19  ;;  %p1692_p0 = scmp.ge.s32.totalorder %s2025_s20, 1  ;;  %s2025_s20 = sphi %s2069_s20, %s15_s20   ;;  %s2021_s19 = sphi %s2067_s19, %s2420_s19   ;;  %s2017_s18 = sphi %s2065_s18, %s2419_s18  }
   0x3   : > { %p29_p1 = scmp.ge.s32.totalorder %s27_s21, 2  ;;  %p219_p2 = scmp.lt.s32.totalorder %s2025_s20, 3 }
   0x5   : > { %s2422_s21 = smov (%p29_p1, %s27_s21), 0  ;;  %p220_p3 = pnand %p1692_p0, %p219_p2 }
   0x6   : > { %p259_p4 = scmp.lt.s32.totalorder (!%p220_p3), %s2017_s18, 1  ;;  %s2027_s29 = smov (!%p220_p3), 127  }
   0x7   : > { %223 = sbr.rel (%p220_p3) target bundleno = 515 (0x203), region = 40  ;;  %s2028_s30 = smov (!%p220_p3), 126  }
   0x8   : > { %s2029_s8 = smov (!%p220_p3), 125   ;;  %s2030_s15 = smov (!%p220_p3), 124  }
   0xc   : > { %s2424_s18 = smov (!%p259_p4, %s2017_s18), 1  ;;  %vm310_vm0 = vcmask 1041408   ;;  %v2109_v10 = vld [vmem:[%s2415_s2 + $0x18] sm:$0xff]  ;;  %vm303_vm1 = vcmask 31744   ;;  %v1937_v14 = vld [vmem:[%s2415_s2 + $0x8] sm:$0xff]  ;;  %v2125_v16 = vld [vmem:[%s2415_s2 + $0x10] sm:$0xff] }
   0xd   : > { %s1693_s22 = sshll.u32 %s2424_s18, 1  ;;  %v1936_v17 = vld [vmem:[%s2415_s2] sm:$0xff]  ;;  %v1941_v35 = vld [vmem:[%s2415_s2 + $0x28] sm:$0xff]  ;;  %v1942_v36 = vld [vmem:[%s2415_s2 + $0x30] sm:$0xff]  ;;  %vm1590_vm6 = vcmask 64512  }
   0xe   : > { %s265_s25 = scalar_lea.vmem %s2413_s0, %s1693_s22  ;;  %s272_s28 = scalar_lea.vmem %s2414_s1, %s1693_s22  ;;  %v1940_v25 = vld [vmem:[%s2415_s2 + $0x20] sm:$0xff]  ;;  %v1943_v43 = vld [vmem:[%s2415_s2 + $0x38] sm:$0xff]  ;;  %v1945_v44 = vld [vmem:[%s2415_s2 + $0x48] sm:$0xff] }
   0xf   : > { %v2089_v0 = vld [vmem:[%s265_s25] sm:$0x3]  ;;  %s2031_s22 = smov 123   ;;  %v1946_v51 = vld [vmem:[%s2415_s2 + $0x50] sm:$0xff]  ;;  %v1947_v57 = vld [vmem:[%s2415_s2 + $0x58] sm:$0xff] }
  0x10   : > { %386 = vst [vmem:[#allocation1] ss:$4 sm:$0xff] %v2089_v0  ;;  %v2095_v1 = vld [vmem:[%s272_s28] sm:$0x3]  ;;  %v350_v13 = vsel %vm310_vm0, %v2089_v0, 0  ;;  %s1935_s28 = sshll.u32 %s2424_s18, 4 }
  0x11   : > { %v312_v9 = vsel %vm310_vm0, %v2095_v1, 0  ;;  %1967 = vmatpush.bf16.msra.mxu3 %v350_v13  ;;  %359 = vmatpush.bf16.msra.mxu1 %v350_v13  ;;  %v1944_v38 = vld [vmem:[%s2415_s2 + $0x40] sm:$0xff]  ;;  %s280_s6 = scalar_lea.vmem %s2418_s5, %s1935_s28 }
  0x12   : > { %1966 = vmatpush.bf16.msra.mxu2 %v312_v9  ;;  %321 = vmatpush.bf16.msra.mxu0 %v312_v9  ;;  %v1948_v62 = vld [vmem:[%s2415_s2 + $0x60] sm:$0xff] }
  0x14   : > { %1720 = vmatmul.msk.bf16.vlgmr.msra.gmra.mxu3 %vm303_vm1, %v1937_v14  ;;  %1719 = vmatmul.msk.bf16.vlgmr.msra.gmra.mxu1 %vm303_vm1, %v1936_v17 }
  0x15   : > { %1710 = vmatmul.msk.bf16.vlgmr.msra.gmra.mxu2 %vm303_vm1, %v2109_v10  ;;  %1709 = vmatmul.msk.bf16.vlgmr.msra.gmra.mxu0 %vm303_vm1, %v2125_v16 }
  0x16   : > { %457 = vmatpush.bf16.msrb.mxu0 %v312_v9 }
  0x17   : > { %v387_v2 = vld.sshfl [vmem:[#allocation1] sm:$0xff pattern:$0x73625140] }
  0x18   : > { %389 = vrot.lane.b32.xlu0 %v387_v2, %s2027_s29  ;;  %423 = vst [vmem:[#allocation1] ss:$4 sm:$0xff] %v2095_v1 }
  0x1f   : > { %v424_v3 = vld.sshfl [vmem:[#allocation1] sm:$0xff pattern:$0x73625140] }
  0x20   : > { %426 = vrot.lane.b32.xlu0 %v424_v3, %s2027_s29  ;;  %484 = vst [vmem:[#allocation1] ss:$4 sm:$0xff] %v2095_v1 }
  0x25   : > { %1737 = vmatmul.msk.bf16.vlgmr.msrb.gmra.mxu0 %vm303_vm1, %v1936_v17 }
  0x27   : > { %v485_v4 = vld.sshfl [vmem:[#allocation1] sm:$0xff pattern:$0x73625140] }
  0x28   : > { %487 = vrot.lane.b32.xlu1 %v485_v4, %s2027_s29  ;;  %521 = vst [vmem:[#allocation1] ss:$4 sm:$0xff] %v2089_v0  ;;  %v1950_v4 = vld [vmem:[%s2415_s2 + $0x70] sm:$0xff] }
  0x2f   : > { %v522_v5 = vld.sshfl [vmem:[#allocation1] sm:$0xff pattern:$0x73625140] }
  0x30   : > { %524 = vrot.lane.b32.xlu1 %v522_v5, %s2027_s29  ;;  %567 = vst [vmem:[#allocation1] ss:$4 sm:$0xff] %v2089_v0 }
  0x35   : > { %1738 = vmatmul.msk.bf16.gmra.mxu0 %vm303_vm1, %v1937_v14 }
  0x37   : > { %v568_v6 = vld.sshfl [vmem:[#allocation1] sm:$0xff pattern:$0x73625140] }
  0x38   : > { %604 = vst [vmem:[#allocation1] ss:$4 sm:$0xff] %v2095_v1  ;;  %570 = vrot.lane.b32.xlu2 %v568_v6, %s2028_s30 }
  0x3f   : > { %v605_v7 = vld.sshfl [vmem:[#allocation1] sm:$0xff pattern:$0x73625140] }
  0x40   : > { %650 = vst [vmem:[#allocation1] ss:$4 sm:$0xff] %v2095_v1  ;;  %607 = vrot.lane.b32.xlu2 %v605_v7, %s2028_s30 }
  0x47   : > { %v651_v8 = vld.sshfl [vmem:[#allocation1] sm:$0xff pattern:$0x73625140] }
  0x48   : > { %653 = vrot.lane.b32.xlu0 %v651_v8, %s2028_s30  ;;  %687 = vst [vmem:[#allocation1] ss:$4 sm:$0xff] %v2089_v0 }
  0x4f   : > { %v688_v11 = vld.sshfl [vmem:[#allocation1] sm:$0xff pattern:$0x73625140] }
  0x50   : > { %690 = vrot.lane.b32.xlu1 %v688_v11, %s2028_s30  ;;  %733 = vst [vmem:[#allocation1] ss:$4 sm:$0xff] %v2089_v0 }
  0x57   : > { %v734_v12 = vld.sshfl [vmem:[#allocation1] sm:$0xff pattern:$0x73625140] }
  0x58   : > { %770 = vst [vmem:[#allocation1] ss:$4 sm:$0xff] %v2095_v1  ;;  %736 = vrot.lane.b32.xlu2 %v734_v12, %s2029_s8 }
  0x5f   : > { %v771_v15 = vld.sshfl [vmem:[#allocation1] sm:$0xff pattern:$0x73625140] }
  0x60   : > { %773 = vrot.lane.b32.xlu0 %v771_v15, %s2029_s8  ;;  %816 = vst [vmem:[#allocation1] ss:$4 sm:$0xff] %v2095_v1  ;;  %v1951_v15 = vld [vmem:[%s2415_s2 + $0x78] sm:$0xff] }
  0x67   : > { %v817_v18 = vld.sshfl [vmem:[#allocation1] sm:$0xff pattern:$0x73625140] }
  0x68   : > { %819 = vrot.lane.b32.xlu1 %v817_v18, %s2029_s8  ;;  %853 = vst [vmem:[#allocation1] ss:$4 sm:$0xff] %v2089_v0 }
  0x6f   : > { %v854_v19 = vld.sshfl [vmem:[#allocation1] sm:$0xff pattern:$0x73625140] }
  0x70   : > { %899 = vst [vmem:[#allocation1] ss:$4 sm:$0xff] %v2089_v0  ;;  %856 = vrot.lane.b32.xlu2 %v854_v19, %s2029_s8  ;;  %s2032_s8 = smov 122   ;;  %v1952_v19 = vld [vmem:[%s2415_s2 + $0x80] sm:$0xff] }
  0x77   : > { %v900_v20 = vld.sshfl [vmem:[#allocation1] sm:$0xff pattern:$0x73625140] }
  0x78   : > { %902 = vrot.lane.b32.xlu0 %v900_v20, %s2030_s15  ;;  %936 = vst [vmem:[#allocation1] ss:$4 sm:$0xff] %v2095_v1 }
  0x7f   : > { %v937_v21 = vld.sshfl [vmem:[#allocation1] sm:$0xff pattern:$0x73625140] }
  0x80   : > { %939 = vrot.lane.b32.xlu1 %v937_v21, %s2030_s15  ;;  %982 = vst [vmem:[#allocation1] ss:$4 sm:$0xff] %v2095_v1  ;;  %v2237_v21 = vld [vmem:[%s2415_s2 + $0x90] sm:$0xff] }
  0x87   : > { %v983_v22 = vld.sshfl [vmem:[#allocation1] sm:$0xff pattern:$0x73625140] }
  0x88   : > { %1019 = vst [vmem:[#allocation1] ss:$4 sm:$0xff] %v2089_v0  ;;  %985 = vrot.lane.b32.xlu2 %v983_v22, %s2030_s15 }
  0x8a   : > { %v390_v23 = vpop.permute.xlu0 %389 }
  0x8b   : > { %v398_v24 = vsel %vm310_vm0, %v390_v23, 0 }
  0x8c   : > { %407 = vmatpush.bf16.msrb.mxu2 %v398_v24 }
  0x8f   : > { %1733 = vmatmul.msk.bf16.vlgmr.msrb.gmra.mxu2 %vm303_vm1, %v1940_v25  ;;  %v1020_v26 = vld.sshfl [vmem:[#allocation1] sm:$0xff pattern:$0x73625140] }
  0x90   : > { %1022 = vrot.lane.b32.xlu0 %v1020_v26, %s2030_s15  ;;  %1065 = vst [vmem:[#allocation1] ss:$4 sm:$0xff] %v2089_v0  ;;  %s2033_s15 = smov 121  }
  0x91   : > { %v361_v11 = vpop.f32.mrf.mxu1 }
  0x92   : > { %v427_v27 = vpop.permute.xlu0 %426  ;;  %v571_v28 = vpop.permute.xlu2 %570 }
  0x93   : > { %v429_v29 = vsel %vm310_vm0, %v427_v27, 0  ;;  %v579_v30 = vsel %vm310_vm0, %v571_v28, 0  ;;  %v323_v9 = vpop.f32.mrf.mxu0 }
  0x94   : > { %438 = vmatpush.bf16.msrb.mxu3 %v429_v29 }
  0x97   : > { %1735 = vmatmul.msk.bf16.vlgmr.msrb.gmra.mxu3 %vm303_vm1, %v1940_v25  ;;  %v1066_v31 = vld.sshfl [vmem:[#allocation1] sm:$0xff pattern:$0x73625140]  ;;  %v1953_v25 = vld [vmem:[%s2415_s2 + $0x88] sm:$0xff] }
  0x98   : > { %588 = vmatpush.bf16.msra.mxu3 %v579_v30  ;;  %1068 = vrot.lane.b32.xlu1 %v1066_v31, %s2031_s22  ;;  %1102 = vst [vmem:[#allocation1] ss:$4 sm:$0xff] %v2095_v1  ;;  %v328_v8 = vpop.f32.mrf.mxu2  ;;  %v2252_v30 = vld [vmem:[%s2415_s2 + $0x98] sm:$0xff] }
  0x9a   : > { %v488_v32 = vpop.permute.xlu1 %487  ;;  %v608_v33 = vpop.permute.xlu2 %607 }
  0x9b   : > { %v496_v34 = vsel %vm310_vm0, %v488_v32, 0  ;;  %v610_v37 = vsel %vm310_vm0, %v608_v33, 0  ;;  %v325_v22 = vpop.f32.mrf.mxu0 }
  0x9c   : > { %505 = vmatpush.bf16.msrb.mxu1 %v496_v34  ;;  %619 = vmatpush.bf16.msra.mxu0 %v610_v37 }
  0x9f   : > { %1734 = vmatmul.msk.bf16.gmra.mxu2 %vm303_vm1, %v1941_v35  ;;  %1751 = vmatmul.msk.bf16.vlgmr.msrb.gmra.mxu1 %vm303_vm1, %v1942_v36  ;;  %v1103_v39 = vld.sshfl [vmem:[#allocation1] sm:$0xff pattern:$0x73625140] }
  0xa0   : > { %1148 = vst [vmem:[#allocation1] ss:$4 sm:$0xff] %v2095_v1  ;;  %1769 = vmatmul.msk.bf16.vlgmr.msra.gmra.mxu0 %vm303_vm1, %v1944_v38  ;;  %1105 = vrot.lane.b32.xlu2 %v1103_v39, %s2031_s22  ;;  %v330_v28 = vpop.f32.mrf.mxu2 }
  0xa2   : > { %v525_v40 = vpop.permute.xlu1 %524 }
  0xa3   : > { %v527_v41 = vsel %vm310_vm0, %v525_v40, 0  ;;  %v459_v27 = vpop.f32.mrf.mxu0 }
  0xa4   : > { %536 = vmatpush.bf16.msra.mxu2 %v527_v41 }
  0xa7   : > { %1736 = vmatmul.msk.bf16.gmra.mxu3 %vm303_vm1, %v1941_v35  ;;  %v1149_v42 = vld.sshfl [vmem:[#allocation1] sm:$0xff pattern:$0x73625140] }
  0xa8   : > { %1151 = vrot.lane.b32.xlu0 %v1149_v42, %s2031_s22  ;;  %1185 = vst [vmem:[#allocation1] ss:$4 sm:$0xff] %v2089_v0 }
  0xab   : > { %v2258_v32 = vpop.f32.mrf.mxu0 }
  0xaf   : > { %1752 = vmatmul.msk.bf16.gmra.mxu1 %vm303_vm1, %v1943_v43  ;;  %1753 = vmatmul.msk.bf16.vlgmr.msra.gmra.mxu2 %vm303_vm1, %v2125_v16  ;;  %v1186_v45 = vld.sshfl [vmem:[#allocation1] sm:$0xff pattern:$0x73625140] }
  0xb0   : > { %1188 = vrot.lane.b32.xlu1 %v1186_v45, %s2031_s22  ;;  %1231 = vst [vmem:[#allocation1] ss:$4 sm:$0xff] %v2089_v0  ;;  %1770 = vmatmul.msk.bf16.gmra.mxu0 %vm303_vm1, %v1945_v44  ;;  %v2270_v45 = vld [vmem:[%s2415_s2 + $0xb0] sm:$0xff] }
  0xb2   : > { %v737_v46 = vpop.permute.xlu2 %736 }
  0xb3   : > { %v745_v47 = vsel %vm310_vm0, %v737_v46, 0  ;;  %v464_v40 = vpop.f32.mrf.mxu0 }
  0xb4   : > { %754 = vmatpush.bf16.msrb.mxu3 %v745_v47 }
  0xb7   : > { %1767 = vmatmul.msk.bf16.vlgmr.msra.gmra.mxu3 %vm303_vm1, %v1944_v38  ;;  %v1232_v48 = vld.sshfl [vmem:[#allocation1] sm:$0xff pattern:$0x73625140]  ;;  %v363_v38 = vpop.f32.mrf.mxu1 }
  0xb8   : > { %1268 = vst [vmem:[#allocation1] ss:$4 sm:$0xff] %v2095_v1  ;;  %1234 = vrot.lane.b32.xlu2 %v1232_v48, %s2032_s8 }
  0xba   : > { %v654_v49 = vpop.permute.xlu0 %653 }
  0xbb   : > { %v662_v50 = vsel %vm310_vm0, %v654_v49, 0  ;;  %v364_v49 = vadd.f32 %v363_v38, %v325_v22 }
  0xbc   : > { %671 = vmatpush.bf16.msra.mxu1 %v662_v50 }
  0xbf   : > { %1754 = vmatmul.msk.bf16.gmra.mxu2 %vm303_vm1, %v2109_v10  ;;  %1783 = vmatmul.msk.bf16.vlgmr.msra.gmra.mxu1 %vm303_vm1, %v1946_v51  ;;  %v1269_v52 = vld.sshfl [vmem:[#allocation1] sm:$0xff pattern:$0x73625140]  ;;  %v366_v10 = vpop.f32.mrf.mxu3 }
  0xc0   : > { %1271 = vrot.lane.b32.xlu0 %v1269_v52, %s2032_s8  ;;  %1314 = vst [vmem:[#allocation1] ss:$4 sm:$0xff] %v2095_v1  ;;  %v2220_v13 = vadd.f32 %v366_v10, %v328_v8 }
  0xc2   : > { %v691_v53 = vpop.permute.xlu1 %690 }
  0xc3   : > { %v693_v54 = vsel %vm310_vm0, %v691_v53, 0 }
  0xc4   : > { %702 = vmatpush.bf16.msrb.mxu2 %v693_v54 }
  0xc7   : > { %1768 = vmatmul.msk.bf16.gmra.mxu3 %vm303_vm1, %v1945_v44  ;;  %v1315_v55 = vld.sshfl [vmem:[#allocation1] sm:$0xff pattern:$0x73625140]  ;;  %v368_v35 = vpop.f32.mrf.mxu3 }
  0xc8   : > { %1317 = vrot.lane.b32.xlu1 %v1315_v55, %s2032_s8  ;;  %1351 = vst [vmem:[#allocation1] ss:$4 sm:$0xff] %v2089_v0  ;;  %v1957_v55 = vld [vmem:[%s2415_s2 + $0xa8] sm:$0xff] }
  0xca   : > { %v857_v56 = vpop.permute.xlu2 %856 }
  0xcb   : > { %v859_v58 = vsel %vm310_vm0, %v857_v56, 0 }
  0xcc   : > { %868 = vmatpush.bf16.msra.mxu2 %v859_v58 }
  0xcf   : > { %v1352_v59 = vld.sshfl [vmem:[#allocation1] sm:$0xff pattern:$0x73625140]  ;;  %1784 = vmatmul.msk.bf16.gmra.mxu1 %vm303_vm1, %v1947_v57  ;;  %1785 = vmatmul.msk.bf16.vlgmr.msrb.gmra.mxu2 %vm303_vm1, %v1942_v36 }
  0xd0   : > { %1397 = vst [vmem:[#allocation1] ss:$4 sm:$0xff] %v2089_v0  ;;  %1354 = vrot.lane.b32.xlu2 %v1352_v59, %s2032_s8  ;;  %v1956_v36 = vld [vmem:[%s2415_s2 + $0xa0] sm:$0xff] }
  0xd2   : > { %v774_v60 = vpop.permute.xlu0 %773 }
  0xd3   : > { %v776_v61 = vsel %vm310_vm0, %v774_v60, 0 }
  0xd4   : > { %785 = vmatpush.bf16.msrb.mxu0 %v776_v61 }
  0xd7   : > { %1799 = vmatmul.msk.bf16.vlgmr.msrb.gmra.mxu3 %vm303_vm1, %v1948_v62  ;;  %1801 = vmatmul.msk.bf16.vlgmr.msrb.gmra.mxu0 %vm303_vm1, %v1948_v62  ;;  %v1398_v63 = vld.sshfl [vmem:[#allocation1] sm:$0xff pattern:$0x73625140]  ;;  %v2287_v62 = vld [vmem:[%s2415_s2 + $0xb8] sm:$0xff] }
  0xd8   : > { %1400 = vrot.lane.b32.xlu0 %v1398_v63, %s2033_s15  ;;  %1434 = vst [vmem:[#allocation1] ss:$4 sm:$0xff] %v2095_v1  ;;  %v1949_v1 = vld [vmem:[%s2415_s2 + $0x68] sm:$0xff] }
  0xda   : > { %v820_v2 = vpop.permute.xlu1 %819 }
  0xdb   : > { %v828_v3 = vsel %vm310_vm0, %v820_v2, 0 }
  0xdc   : > { %837 = vmatpush.bf16.msrb.mxu1 %v828_v3 }
  0xdf   : > { %1786 = vmatmul.msk.bf16.gmra.mxu2 %vm303_vm1, %v1943_v43  ;;  %1815 = vmatmul.msk.bf16.vlgmr.msrb.gmra.mxu1 %vm303_vm1, %v1950_v4  ;;  %v1435_v5 = vld.sshfl [vmem:[#allocation1] sm:$0xff pattern:$0x73625140] }
  0xe0   : > { %1437 = vrot.lane.b32.xlu1 %v1435_v5, %s2033_s15  ;;  %1465 = vst [vmem:[#allocation1] ss:$4 sm:$0xff] %v2089_v0  ;;  %v362_v0 = vadd.f32 %v361_v11, %v323_v9 }
  0xe2   : > { %v986_v6 = vpop.permute.xlu2 %985 }
  0xe3   : > { %v994_v7 = vsel %vm310_vm0, %v986_v6, 0 }
  0xe4   : > { %1003 = vmatpush.bf16.msra.mxu1 %v994_v7 }
  0xe7   : > { %1800 = vmatmul.msk.bf16.gmra.mxu3 %vm303_vm1, %v1949_v1  ;;  %1802 = vmatmul.msk.bf16.gmra.mxu0 %vm303_vm1, %v1949_v1  ;;  %v1466_v12 = vld.sshfl [vmem:[#allocation1] sm:$0xff pattern:$0x73625140]  ;;  %v369_v1 = vadd.f32 %v368_v35, %v330_v28 }
  0xe8   : > { %1468 = vrot.lane.b32.xlu2 %v1466_v12, %s2033_s15 }
  0xea   : > { %v903_v14 = vpop.permute.xlu0 %902 }
  0xeb   : > { %v911_v16 = vsel %vm310_vm0, %v903_v14, 0 }
  0xec   : > { %920 = vmatpush.bf16.msra.mxu3 %v911_v16 }
  0xef   : > { %1816 = vmatmul.msk.bf16.gmra.mxu1 %vm303_vm1, %v1951_v15  ;;  %1817 = vmatmul.msk.bf16.vlgmr.msra.gmra.mxu2 %vm303_vm1, %v1946_v51 }
  0xf2   : > { %v940_v17 = vpop.permute.xlu1 %939 }
  0xf3   : > { %v942_v18 = vsel %vm310_vm0, %v940_v17, 0 }
  0xf4   : > { %951 = vmatpush.bf16.msra.mxu0 %v942_v18 }
  0xf7   : > { %1831 = vmatmul.msk.bf16.vlgmr.msra.gmra.mxu3 %vm303_vm1, %v1952_v19  ;;  %1833 = vmatmul.msk.bf16.vlgmr.msra.gmra.mxu0 %vm303_vm1, %v1952_v19 }
  0xfa   : > { %v1106_v20 = vpop.permute.xlu2 %1105 }
  0xfb   : > { %v1108_v23 = vsel %vm310_vm0, %v1106_v20, 0 }
  0xfc   : > { %1117 = vmatpush.bf16.msrb.mxu0 %v1108_v23  ;;  %v2309_v23 = vld [vmem:[%s2415_s2 + $0xd0] sm:$0xff] }
  0xff   : > { %1818 = vmatmul.msk.bf16.gmra.mxu2 %vm303_vm1, %v1947_v57  ;;  %1847 = vmatmul.msk.bf16.vlgmr.msra.gmra.mxu1 %vm303_vm1, %v2237_v21  ;;  %v2280_v57 = vpop.f32.mrf.mxu0 }
 0x102   : > { %v1023_v24 = vpop.permute.xlu0 %1022 }
 0x103   : > { %v1025_v26 = vsel %vm310_vm0, %v1023_v24, 0 }
 0x104   : > { %1034 = vmatpush.bf16.msrb.mxu2 %v1025_v26 }
 0x107   : > { %1832 = vmatmul.msk.bf16.gmra.mxu3 %vm303_vm1, %v1953_v25  ;;  %1834 = vmatmul.msk.bf16.gmra.mxu0 %vm303_vm1, %v1953_v25 }
 0x10a   : > { %v1069_v29 = vpop.permute.xlu1 %1068 }
 0x10b   : > { %v1077_v31 = vsel %vm310_vm0, %v1069_v29, 0 }
 0x10c   : > { %1086 = vmatpush.bf16.msrb.mxu3 %v1077_v31 }
 0x10f   : > { %1848 = vmatmul.msk.bf16.gmra.mxu1 %vm303_vm1, %v2252_v30  ;;  %1849 = vmatmul.msk.bf16.vlgmr.msrb.gmra.mxu2 %vm303_vm1, %v1950_v4 }
 0x112   : > { %v409_v33 = vpop.f32.mrf.mxu2  ;;  %v1235_v37 = vpop.permute.xlu2 %1234 }
 0x113   : > { %v419_v34 = vadd.f32 %v409_v33, %v362_v0  ;;  %v1243_v39 = vsel %vm310_vm0, %v1235_v37, 0 }
 0x114   : > { %1252 = vmatpush.bf16.msra.mxu3 %v1243_v39 }
 0x117   : > { %1863 = vmatmul.msk.bf16.vlgmr.msrb.gmra.mxu3 %vm303_vm1, %v1956_v36  ;;  %1865 = vmatmul.msk.bf16.vlgmr.msrb.gmra.mxu0 %vm303_vm1, %v1956_v36 }
 0x11a   : > { %v411_v41 = vpop.f32.mrf.mxu2  ;;  %v1152_v42 = vpop.permute.xlu0 %1151 }
 0x11b   : > { %v1160_v43 = vsel %vm310_vm0, %v1152_v42, 0  ;;  %v440_v44 = vpop.f32.mrf.mxu3  ;;  %v420_v52 = vadd.f32 %v411_v41, %v364_v49 }
 0x11c   : > { %v460_v46 = vadd.f32 %v459_v27, %v440_v44  ;;  %v507_v47 = vpop.f32.mrf.mxu1  ;;  %1169 = vmatpush.bf16.msrb.mxu1 %v1160_v43  ;;  %v1496_v44 = vld [vmem:[%s2416_s3] sm:$0xff] }
 0x11d   : > { %v517_v48 = vadd.f32 %v507_v47, %v419_v34  ;;  %v621_v6 = vpop.f32.mrf.mxu0  ;;  %v1961_v34 = vld [vmem:[%s2415_s2 + $0xc8] sm:$0xff] }
 0x11f   : > { %1850 = vmatmul.msk.bf16.gmra.mxu2 %vm303_vm1, %v1951_v15  ;;  %1879 = vmatmul.msk.bf16.vlgmr.msrb.gmra.mxu1 %vm303_vm1, %v2270_v45 }
 0x122   : > { %v414_v50 = vpop.f32.mrf.mxu2  ;;  %v1189_v51 = vpop.permute.xlu1 %1188 }
 0x123   : > { %v421_v53 = vadd.f32 %v414_v50, %v2220_v13  ;;  %v442_v54 = vpop.f32.mrf.mxu3  ;;  %v1191_v56 = vsel %vm310_vm0, %v1189_v51, 0  ;;  %v1960_v13 = vld [vmem:[%s2415_s2 + $0xc0] sm:$0xff] }
 0x124   : > { %v509_v58 = vpop.f32.mrf.mxu1  ;;  %1200 = vmatpush.bf16.msra.mxu2 %v1191_v56  ;;  %v462_v17 = vadd.f32 %v2258_v32, %v442_v54 }
 0x125   : > { %v518_v59 = vadd.f32 %v509_v58, %v420_v52  ;;  %v623_v16 = vpop.f32.mrf.mxu0 }
 0x127   : > { %1864 = vmatmul.msk.bf16.gmra.mxu3 %vm303_vm1, %v1957_v55  ;;  %1866 = vmatmul.msk.bf16.gmra.mxu0 %vm303_vm1, %v1957_v55  ;;  %v1499_v55 = vld [vmem:[%s2416_s3 + $0x18] sm:$0xff] }
 0x12a   : > { %v416_v60 = vpop.f32.mrf.mxu2  ;;  %v1355_v63 = vpop.permute.xlu2 %1354 }
 0x12b   : > { %v445_v61 = vpop.f32.mrf.mxu3  ;;  %v1357_v4 = vsel %vm310_vm0, %v1355_v63, 0  ;;  %v422_v9 = vadd.f32 %v416_v60, %v369_v1 }
 0x12c   : > { %v465_v2 = vadd.f32 %v464_v40, %v445_v61  ;;  %v512_v3 = vpop.f32.mrf.mxu1  ;;  %1366 = vmatpush.bf16.msrb.mxu2 %v1357_v4  ;;  %v1497_v40 = vld [vmem:[%s2416_s3 + $0x8] sm:$0xff]  ;;  %v1964_v61 = vld [vmem:[%s2415_s2 + $0xe0] sm:$0xff] }
 0x12d   : > { %v2290_v5 = vadd.f32 %v512_v3, %v421_v53  ;;  %v626_v28 = vpop.f32.mrf.mxu0 }
 0x12f   : > { %1880 = vmatmul.msk.bf16.gmra.mxu1 %vm303_vm1, %v2287_v62  ;;  %1881 = vmatmul.msk.bf16.vlgmr.msra.gmra.mxu2 %vm303_vm1, %v2237_v21 }
 0x132   : > { %v538_v7 = vpop.f32.mrf.mxu2  ;;  %v1272_v8 = vpop.permute.xlu0 %1271 }
 0x133   : > { %v548_v10 = vadd.f32 %v538_v7, %v460_v46  ;;  %v1274_v11 = vsel %vm310_vm0, %v1272_v8, 0  ;;  %v447_v12 = vpop.f32.mrf.mxu3 }
 0x134   : > { %v514_v0 = vpop.f32.mrf.mxu1  ;;  %1283 = vmatpush.bf16.msra.mxu0 %v1274_v11  ;;  %v467_v41 = vadd.f32 %v2280_v57, %v447_v12  ;;  %v1498_v12 = vld [vmem:[%s2416_s3 + $0x10] sm:$0xff] }
 0x135   : > { %v2300_v14 = vadd.f32 %v514_v0, %v422_v9  ;;  %v631_v15 = vadd.f32 %v621_v6, %v548_v10  ;;  %v628_v51 = vpop.f32.mrf.mxu0  ;;  %v1502_v6 = vld [vmem:[%s2417_s4 + $0x10] sm:$0xff] }
 0x137   : > { %1895 = vmatmul.msk.bf16.vlgmr.msra.gmra.mxu3 %vm303_vm1, %v1960_v13  ;;  %1897 = vmatmul.msk.bf16.vlgmr.msra.gmra.mxu0 %vm303_vm1, %v1960_v13 }
 0x13a   : > { %v540_v18 = vpop.f32.mrf.mxu2  ;;  %v1318_v19 = vpop.permute.xlu1 %1317 }
 0x13b   : > { %v549_v20 = vadd.f32 %v540_v18, %v462_v17  ;;  %v1326_v21 = vsel %vm310_vm0, %v1318_v19, 0  ;;  %v590_v22 = vpop.f32.mrf.mxu3  ;;  %v1965_v17 = vld [vmem:[%s2415_s2 + $0xe8] sm:$0xff] }
 0x13c   : > { %v600_v24 = vadd.f32 %v590_v22, %v517_v48  ;;  %v673_v25 = vpop.f32.mrf.mxu1  ;;  %1335 = vmatpush.bf16.msra.mxu1 %v1326_v21  ;;  %v2333_v48 = vld [vmem:[%s2415_s2 + $0xd8] sm:$0xff]  ;;  %v1500_v21 = vld [vmem:[%s2417_s4] sm:$0xff] }
 0x13d   : > { %v632_v26 = vadd.f32 %v623_v16, %v549_v20 }
 0x13e   : > { %v2311_v27 = vadd.f32 %v673_v25, %v600_v24 }
 0x13f   : > { %1882 = vmatmul.msk.bf16.gmra.mxu2 %vm303_vm1, %v2252_v30  ;;  %1911 = vmatmul.msk.bf16.vlgmr.msra.gmra.mxu1 %vm303_vm1, %v2309_v23  ;;  %v2034_v30 = vmov 0  }
 0x140   : > { %2000 = vset.pattern.permute.xlu0 %v2034_v30  ;;  %2001 = vset.pattern.permute.xlu1 %v2034_v30 }
 0x141   : > { %1511 = vperm.xlu1 %2001, %v1497_v40   ;;  %2002 = vset.pattern.permute.xlu2 %v2034_v30 }
 0x142   : > { %v543_v29 = vpop.f32.mrf.mxu2  ;;  %v1469_v31 = vpop.permute.xlu2 %1468  ;;  %1506 = vperm.xlu0 %2000, %v1496_v44   ;;  %1516 = vperm.xlu2 %2002, %v1498_v12  }
 0x143   : > { %v550_v32 = vadd.f32 %v543_v29, %v465_v2  ;;  %v592_v33 = vpop.f32.mrf.mxu3  ;;  %v1471_v35 = vsel %vm310_vm0, %v1469_v31, 0 }
 0x144   : > { %v601_v36 = vadd.f32 %v592_v33, %v518_v59  ;;  %v675_v37 = vpop.f32.mrf.mxu1  ;;  %1480 = vmatpush.bf16.msrb.mxu1 %v1471_v35 }
 0x145   : > { %v633_v38 = vadd.f32 %v626_v28, %v550_v32  ;;  %v1503_v32 = vld [vmem:[%s2417_s4 + $0x18] sm:$0xff] }
 0x146   : > { %v684_v39 = vadd.f32 %v675_v37, %v601_v36 }
 0x147   : > { %1896 = vmatmul.msk.bf16.gmra.mxu3 %vm303_vm1, %v1961_v34  ;;  %1898 = vmatmul.msk.bf16.gmra.mxu0 %vm303_vm1, %v1961_v34 }
 0x149   : > { %1521 = vperm.xlu1 %2001, %v1499_v55  }
 0x14a   : > { %v545_v42 = vpop.f32.mrf.mxu2  ;;  %v1401_v43 = vpop.permute.xlu0 %1400  ;;  %1530 = vperm.xlu2 %2002, %v1500_v21  }
 0x14b   : > { %v551_v46 = vadd.f32 %v545_v42, %v467_v41  ;;  %v595_v47 = vpop.f32.mrf.mxu3  ;;  %v1409_v49 = vsel %vm310_vm0, %v1401_v43, 0 }
 0x14c   : > { %v602_v50 = vadd.f32 %v595_v47, %v2290_v5  ;;  %v678_v52 = vpop.f32.mrf.mxu1  ;;  %1418 = vmatpush.bf16.msrb.mxu3 %v1409_v49 }
 0x14d   : > { %v634_v53 = vadd.f32 %v628_v51, %v551_v46 }
 0x14e   : > { %v685_v54 = vadd.f32 %v678_v52, %v602_v50 }
 0x14f   : > { %1912 = vmatmul.msk.bf16.gmra.mxu1 %vm303_vm1, %v2333_v48  ;;  %1913 = vmatmul.msk.bf16.vlgmr.msrb.gmra.mxu2 %vm303_vm1, %v2270_v45  ;;  %v1501_v45 = vld [vmem:[%s2417_s4 + $0x8] sm:$0xff] }
 0x150   : > { %1535 = vperm.xlu0 %2000, %v1501_v45  }
 0x151   : > { %1540 = vperm.xlu1 %2001, %v1502_v6  }
 0x152   : > { %v704_v56 = vpop.f32.mrf.mxu2  ;;  %v1438_v57 = vpop.permute.xlu1 %1437  ;;  %1545 = vperm.xlu2 %2002, %v1503_v32  }
 0x153   : > { %v714_v58 = vadd.f32 %v704_v56, %v631_v15  ;;  %v1440_v59 = vsel %vm310_vm0, %v1438_v57, 0  ;;  %v597_v60 = vpop.f32.mrf.mxu3 }
 0x154   : > { %v603_v63 = vadd.f32 %v597_v60, %v2300_v14  ;;  %v680_v2 = vpop.f32.mrf.mxu1  ;;  %v787_v3 = vpop.f32.mrf.mxu0  ;;  %1449 = vmatpush.bf16.msrb.mxu0 %v1440_v59 }
 0x155   : > { %v797_v4 = vadd.f32 %v787_v3, %v714_v58 }
 0x156   : > { %v686_v5 = vadd.f32 %v680_v2, %v603_v63 }
 0x157   : > { %1927 = vmatmul.msk.bf16.vlgmr.msrb.gmra.mxu3 %vm303_vm1, %v1964_v61  ;;  %1929 = vmatmul.msk.bf16.vlgmr.msrb.gmra.mxu0 %vm303_vm1, %v1964_v61 }
 0x15a   : > { %v706_v1 = vpop.f32.mrf.mxu2 }
 0x15b   : > { %v715_v7 = vadd.f32 %v706_v1, %v632_v26  ;;  %v756_v8 = vpop.f32.mrf.mxu3 }
 0x15c   : > { %v766_v9 = vadd.f32 %v756_v8, %v2311_v27  ;;  %v789_v10 = vpop.f32.mrf.mxu0  ;;  %v839_v11 = vpop.f32.mrf.mxu1 }
 0x15d   : > { %v798_v13 = vadd.f32 %v789_v10, %v715_v7 }
 0x15e   : > { %v849_v0 = vadd.f32 %v839_v11, %v766_v9 }
 0x15f   : > { %1914 = vmatmul.msk.bf16.gmra.mxu2 %vm303_vm1, %v2287_v62  ;;  %1931 = vmatmul.msk.bf16.vlgmr.msrb.gmra.mxu1 %vm303_vm1, %v2309_v23 }
 0x162   : > { %v709_v14 = vpop.f32.mrf.mxu2 }
 0x163   : > { %v716_v15 = vadd.f32 %v709_v14, %v633_v38  ;;  %v758_v16 = vpop.f32.mrf.mxu3 }
 0x164   : > { %v767_v18 = vadd.f32 %v758_v16, %v684_v39  ;;  %v792_v19 = vpop.f32.mrf.mxu0  ;;  %v841_v20 = vpop.f32.mrf.mxu1 }
 0x165   : > { %v799_v22 = vadd.f32 %v792_v19, %v716_v15 }
 0x166   : > { %v850_v62 = vadd.f32 %v841_v20, %v767_v18 }
 0x167   : > { %1928 = vmatmul.msk.bf16.gmra.mxu3 %vm303_vm1, %v1965_v17  ;;  %1930 = vmatmul.msk.bf16.gmra.mxu0 %vm303_vm1, %v1965_v17 }
 0x16a   : > { %v711_v23 = vpop.f32.mrf.mxu2 }
 0x16b   : > { %v717_v24 = vadd.f32 %v711_v23, %v634_v53  ;;  %v761_v25 = vpop.f32.mrf.mxu3 }
 0x16c   : > { %v768_v26 = vadd.f32 %v761_v25, %v685_v54  ;;  %v794_v27 = vpop.f32.mrf.mxu0  ;;  %v844_v28 = vpop.f32.mrf.mxu1 }
 0x16d   : > { %v800_v29 = vadd.f32 %v794_v27, %v717_v24 }
 0x16e   : > { %v851_v31 = vadd.f32 %v844_v28, %v768_v26 }
 0x16f   : > { %1932 = vmatmul.msk.bf16.gmra.mxu1 %vm303_vm1, %v2333_v48 }
 0x172   : > { %v870_v33 = vpop.f32.mrf.mxu2 }
 0x173   : > { %v763_v34 = vpop.f32.mrf.mxu3  ;;  %v880_v35 = vadd.f32 %v870_v33, %v797_v4 }
 0x174   : > { %v769_v36 = vadd.f32 %v763_v34, %v686_v5  ;;  %v953_v37 = vpop.f32.mrf.mxu0  ;;  %v846_v38 = vpop.f32.mrf.mxu1 }
 0x175   : > { %v963_v39 = vadd.f32 %v953_v37, %v880_v35 }
 0x176   : > { %v852_v30 = vadd.f32 %v846_v38, %v769_v36 }
 0x17a   : > { %v872_v40 = vpop.f32.mrf.mxu2 }
 0x17b   : > { %v881_v41 = vadd.f32 %v872_v40, %v798_v13  ;;  %v922_v42 = vpop.f32.mrf.mxu3 }
 0x17c   : > { %v932_v43 = vadd.f32 %v922_v42, %v849_v0  ;;  %v955_v44 = vpop.f32.mrf.mxu0  ;;  %v1005_v46 = vpop.f32.mrf.mxu1 }
 0x17d   : > { %v964_v47 = vadd.f32 %v955_v44, %v881_v41 }
 0x17e   : > { %v1015_v49 = vadd.f32 %v1005_v46, %v932_v43 }
 0x182   : > { %v875_v50 = vpop.f32.mrf.mxu2 }
 0x183   : > { %v882_v51 = vadd.f32 %v875_v50, %v799_v22  ;;  %v924_v48 = vpop.f32.mrf.mxu3 }
 0x184   : > { %v933_v52 = vadd.f32 %v924_v48, %v850_v62  ;;  %v958_v53 = vpop.f32.mrf.mxu0  ;;  %v1007_v54 = vpop.f32.mrf.mxu1 }
 0x185   : > { %v965_v55 = vadd.f32 %v958_v53, %v882_v51 }
 0x186   : > { %v1016_v56 = vadd.f32 %v1007_v54, %v933_v52 }
 0x18a   : > { %v877_v57 = vpop.f32.mrf.mxu2 }
 0x18b   : > { %v883_v58 = vadd.f32 %v877_v57, %v800_v29  ;;  %v927_v59 = vpop.f32.mrf.mxu3 }
 0x18c   : > { %v934_v60 = vadd.f32 %v927_v59, %v851_v31  ;;  %v960_v61 = vpop.f32.mrf.mxu0  ;;  %v1010_v63 = vpop.f32.mrf.mxu1 }
 0x18d   : > { %v2378_v2 = vadd.f32 %v960_v61, %v883_v58 }
 0x18e   : > { %v1017_v3 = vadd.f32 %v1010_v63, %v934_v60 }
 0x192   : > { %v1036_v45 = vpop.f32.mrf.mxu2 }
 0x193   : > { %v929_v4 = vpop.f32.mrf.mxu3  ;;  %v1046_v5 = vadd.f32 %v1036_v45, %v963_v39 }
 0x194   : > { %v935_v6 = vadd.f32 %v929_v4, %v852_v30  ;;  %v1012_v1 = vpop.f32.mrf.mxu1  ;;  %v1119_v7 = vpop.f32.mrf.mxu0 }
 0x195   : > { %v1129_v8 = vadd.f32 %v1119_v7, %v1046_v5 }
 0x196   : > { %v2380_v9 = vadd.f32 %v1012_v1, %v935_v6 }
 0x19a   : > { %v1038_v10 = vpop.f32.mrf.mxu2 }
 0x19b   : > { %v1047_v11 = vadd.f32 %v1038_v10, %v964_v47  ;;  %v1088_v12 = vpop.f32.mrf.mxu3 }
 0x19c   : > { %v1098_v13 = vadd.f32 %v1088_v12, %v1015_v49  ;;  %v1121_v0 = vpop.f32.mrf.mxu0  ;;  %v1171_v14 = vpop.f32.mrf.mxu1 }
 0x19d   : > { %v1130_v15 = vadd.f32 %v1121_v0, %v1047_v11  ;;  %v1517_v58 = vpop.permute.xlu2 %1516 }
 0x19e   : > { %v1181_v16 = vadd.f32 %v1171_v14, %v1098_v13 }
 0x1a2   : > { %v1041_v17 = vpop.f32.mrf.mxu2 }
 0x1a3   : > { %v1090_v18 = vpop.f32.mrf.mxu3  ;;  %v1048_v50 = vadd.f32 %v1041_v17, %v965_v55 }
 0x1a4   : > { %v1099_v19 = vadd.f32 %v1090_v18, %v1016_v56  ;;  %v1124_v20 = vpop.f32.mrf.mxu0  ;;  %v1173_v21 = vpop.f32.mrf.mxu1 }
 0x1a5   : > { %v1131_v59 = vadd.f32 %v1124_v20, %v1048_v50 }
 0x1a6   : > { %v1182_v22 = vadd.f32 %v1173_v21, %v1099_v19  ;;  %v1531_v21 = vpop.permute.xlu2 %1530 }
 0x1aa   : > { %v1043_v62 = vpop.f32.mrf.mxu2 }
 0x1ab   : > { %v1093_v23 = vpop.f32.mrf.mxu3  ;;  %v1049_v6 = vadd.f32 %v1043_v62, %v2378_v2 }
 0x1ac   : > { %v1126_v24 = vpop.f32.mrf.mxu0  ;;  %v1176_v25 = vpop.f32.mrf.mxu1  ;;  %v1100_v60 = vadd.f32 %v1093_v23, %v1017_v3 }
 0x1ae   : > { %v1183_v7 = vadd.f32 %v1176_v25, %v1100_v60 }
 0x1b2   : > { %v1202_v26 = vpop.f32.mrf.mxu2 }
 0x1b3   : > { %v1095_v27 = vpop.f32.mrf.mxu3  ;;  %v1212_v47 = vadd.f32 %v1202_v26, %v1129_v8  ;;  %v2386_v48 = vpop.permute.xlu1 %1511 }
 0x1b4   : > { %v2382_v28 = vpop.f32.mrf.mxu1  ;;  %v1285_v29 = vpop.f32.mrf.mxu0  ;;  %v1101_v20 = vadd.f32 %v1095_v27, %v2380_v9 }
 0x1b5   : > { %v1295_v52 = vadd.f32 %v1285_v29, %v1212_v47  ;;  %v1507_v8 = vpop.permute.xlu0 %1506 }
 0x1ba   : > { %v1204_v31 = vpop.f32.mrf.mxu2 }
 0x1bb   : > { %v1254_v32 = vpop.f32.mrf.mxu3  ;;  %v1213_v61 = vadd.f32 %v1204_v31, %v1130_v15  ;;  %v2389_v0 = vpop.permute.xlu1 %1521  ;;  %v1132_v15 = vadd.f32 %v1126_v24, %v1049_v6 }
 0x1bc   : > { %v1287_v33 = vpop.f32.mrf.mxu0  ;;  %v1337_v34 = vpop.f32.mrf.mxu1  ;;  %v1264_v56 = vadd.f32 %v1254_v32, %v1181_v16 }
 0x1bd   : > { %v1296_v12 = vadd.f32 %v1287_v33, %v1213_v61  ;;  %v1184_v33 = vadd.f32 %v2382_v28, %v1101_v20 }
 0x1be   : > { %v1347_v63 = vadd.f32 %v1337_v34, %v1264_v56 }
 0x1c2   : > { %v1207_v35 = vpop.f32.mrf.mxu2 }
 0x1c3   : > { %v1256_v36 = vpop.f32.mrf.mxu3  ;;  %v1214_v45 = vadd.f32 %v1207_v35, %v1131_v59 }
 0x1c4   : > { %v1290_v37 = vpop.f32.mrf.mxu0  ;;  %v1339_v38 = vpop.f32.mrf.mxu1  ;;  %v1265_v14 = vadd.f32 %v1256_v36, %v1182_v22 }
 0x1c5   : > { %v1297_v13 = vadd.f32 %v1290_v37, %v1214_v45 }
 0x1c6   : > { %v1348_v23 = vadd.f32 %v1339_v38, %v1265_v14  ;;  %v1541_v38 = vpop.permute.xlu1 %1540 }
 0x1ca   : > { %v1209_v39 = vpop.f32.mrf.mxu2 }
 0x1cb   : > { %v1259_v30 = vpop.f32.mrf.mxu3  ;;  %v1215_v62 = vadd.f32 %v1209_v39, %v1132_v15 }
 0x1cc   : > { %v1292_v40 = vpop.f32.mrf.mxu0  ;;  %v1342_v41 = vpop.f32.mrf.mxu1  ;;  %v1266_v16 = vadd.f32 %v1259_v30, %v1183_v7 }
 0x1cd   : > { %v1298_v37 = vadd.f32 %v1292_v40, %v1215_v62 }
 0x1ce   : > { %v1349_v25 = vadd.f32 %v1342_v41, %v1266_v16 }
 0x1d2   : > { %v1368_v42 = vpop.f32.mrf.mxu2 }
 0x1d3   : > { %v1261_v43 = vpop.f32.mrf.mxu3  ;;  %v1378_v57 = vadd.f32 %v1368_v42, %v1295_v52 }
 0x1d4   : > { %v2384_v44 = vpop.f32.mrf.mxu1  ;;  %v1451_v46 = vpop.f32.mrf.mxu0  ;;  %v1267_v9 = vadd.f32 %v1261_v43, %v1184_v33 }
 0x1d5   : > { %v1461_v4 = vadd.f32 %v1451_v46, %v1378_v57 }
 0x1da   : > { %v1370_v49 = vpop.f32.mrf.mxu2 }
 0x1db   : > { %v1420_v51 = vpop.f32.mrf.mxu3  ;;  %v1379_v17 = vadd.f32 %v1370_v49, %v1296_v12 }
 0x1dc   : > { %v1453_v53 = vpop.f32.mrf.mxu0  ;;  %v1482_v54 = vpop.f32.mrf.mxu1  ;;  %v1430_v1 = vadd.f32 %v1420_v51, %v1347_v63 }
 0x1dd   : > { %v1492_v10 = vadd.f32 %v1482_v54, %v1461_v4  ;;  %v1462_v26 = vadd.f32 %v1453_v53, %v1379_v17  ;;  %v1536_v51 = vpop.permute.xlu0 %1535  ;;  %v1350_v53 = vadd.f32 %v2384_v44, %v1267_v9 }
 0x1de   : > { %v1524_v18 = vmul.f32 %v1507_v8, %v1430_v1 }
 0x1df   : > { %v1564_v2 = vmul.f32 %v1507_v8, %v1492_v10 }
 0x1e0   : > { %v1548_v29 = vadd.f32 %v1531_v21, %v1524_v18 }
 0x1e1   : > { %v1568_v22 = vadd.f32 %v1564_v2, %v1531_v21 }
 0x1e2   : > { %v1373_v5 = vpop.f32.mrf.mxu2  ;;  %v1556_v46 = vmul.f32 0.01, %v1548_v29  ;;  %vm1552_vm2 = vcmp.ge.f32.partialorder %v1548_v29, 0.0 }
 0x1e3   : > { %v1422_v55 = vpop.f32.mrf.mxu3  ;;  %v1380_v19 = vadd.f32 %v1373_v5, %v1297_v13  ;;  %v1576_v47 = vmul.f32 0.01, %v1568_v22  ;;  %vm1572_vm3 = vcmp.ge.f32.partialorder %v1568_v22, 0.0 }
 0x1e4   : > { %v1484_v11 = vpop.f32.mrf.mxu1  ;;  %v1456_v3 = vpop.f32.mrf.mxu0  ;;  %v1431_v34 = vadd.f32 %v1422_v55, %v1348_v23  ;;  %v1560_v54 = vsel %vm1552_vm2, %v1548_v29, %v1556_v46 }
 0x1e5   : > { %v1463_v31 = vadd.f32 %v1456_v3, %v1380_v19  ;;  %v1493_v30 = vadd.f32 %v1484_v11, %v1462_v26  ;;  %v1580_v59 = vsel %vm1572_vm3, %v1568_v22, %v1576_v47  ;;  %v1546_v55 = vpop.permute.xlu2 %1545 }
 0x1e6   : > { %v1525_v49 = vmul.f32 %v2386_v48, %v1431_v34 }
 0x1e7   : > { %v1565_v52 = vmul.f32 %v2386_v48, %v1493_v30 }
 0x1e8   : > { %v1549_v60 = vadd.f32 %v1536_v51, %v1525_v49 }
 0x1e9   : > { %v1569_v4 = vadd.f32 %v1565_v52, %v1536_v51 }
 0x1ea   : > { %v1375_v35 = vpop.f32.mrf.mxu2  ;;  %v1557_v8 = vmul.f32 0.01, %v1549_v60  ;;  %vm1553_vm7 = vcmp.ge.f32.partialorder %v1549_v60, 0.0 }
 0x1eb   : > { %v1425_v32 = vpop.f32.mrf.mxu3  ;;  %v1381_v39 = vadd.f32 %v1375_v35, %v1298_v37  ;;  %v1577_v12 = vmul.f32 0.01, %v1569_v4  ;;  %vm1573_vm8 = vcmp.ge.f32.partialorder %v1569_v4, 0.0 }
 0x1ec   : > { %v1432_v24 = vadd.f32 %v1425_v32, %v1349_v25  ;;  %v1487_v36 = vpop.f32.mrf.mxu1  ;;  %v1458_v50 = vpop.f32.mrf.mxu0  ;;  %v1561_v3 = vsel %vm1553_vm7, %v1549_v60, %v1557_v8 }
 0x1ed   : > { %v1494_v42 = vadd.f32 %v1487_v36, %v1463_v31  ;;  %v1464_v56 = vadd.f32 %v1458_v50, %v1381_v39  ;;  %v1581_v17 = vsel %vm1573_vm8, %v1569_v4, %v1577_v12 }
 0x1ee   : > { %v1526_v27 = vmul.f32 %v1517_v58, %v1432_v24 }
 0x1ef   : > { %v1566_v41 = vmul.f32 %v1517_v58, %v1494_v42 }
 0x1f0   : > { %v1550_v28 = vadd.f32 %v1541_v38, %v1526_v27 }
 0x1f1   : > { %v1570_v40 = vadd.f32 %v1566_v41, %v1541_v38 }
 0x1f2   : > { %vm1554_vm4 = vcmp.ge.f32.partialorder %v1550_v28, 0.0  ;;  %v1558_v43 = vmul.f32 0.01, %v1550_v28 }
 0x1f3   : > { %vm1574_vm5 = vcmp.ge.f32.partialorder %v1570_v40, 0.0  ;;  %v1578_v57 = vmul.f32 0.01, %v1570_v40  ;;  %v1427_v58 = vpop.f32.mrf.mxu3 }
 0x1f4   : > { %v1562_v61 = vsel %vm1554_vm4, %v1550_v28, %v1558_v43  ;;  %v1433_v63 = vadd.f32 %v1427_v58, %v1350_v53  ;;  %v1489_v45 = vpop.f32.mrf.mxu1 }
 0x1f5   : > { %v1582_v5 = vsel %vm1574_vm5, %v1570_v40, %v1578_v57  ;;  %v1584_v6 = vadd.f32 %v1562_v61, %v1560_v54  ;;  %v1495_v48 = vadd.f32 %v1489_v45, %v1464_v56 }
 0x1f6   : > { %v1586_v1 = vadd.f32 %v1582_v5, %v1580_v59  ;;  %v1527_v44 = vmul.f32 %v2389_v0, %v1433_v63 }
 0x1f7   : > { %v1567_v7 = vmul.f32 %v2389_v0, %v1495_v48 }
 0x1f8   : > { %v1588_v10 = vadd.f32 %v1586_v1, %v1584_v6  ;;  %v1551_v11 = vadd.f32 %v1546_v55, %v1527_v44 }
 0x1f9   : > { %v1571_v13 = vadd.f32 %v1567_v7, %v1546_v55 }
 0x1fa   : > { %1591 = vst.msk [vmem:[%s280_s6] sm:$0xff] %vm1590_vm6, %v1588_v10  ;;  %vm1555_vm9 = vcmp.ge.f32.partialorder %v1551_v11, 0.0  ;;  %v1559_v14 = vmul.f32 0.01, %v1551_v11 }
 0x1fb   : > { %vm1575_vm10 = vcmp.ge.f32.partialorder %v1571_v13, 0.0  ;;  %v1579_v16 = vmul.f32 0.01, %v1571_v13 }
 0x1fc   : > { %v1563_v15 = vsel %vm1555_vm9, %v1551_v11, %v1559_v14 }
 0x1fd   : > { %v1583_v18 = vsel %vm1575_vm10, %v1571_v13, %v1579_v16  ;;  %v1585_v19 = vadd.f32 %v1563_v15, %v1561_v3 }
 0x1fe   : > { %v1587_v20 = vadd.f32 %v1583_v18, %v1581_v17 }
 0x200   : > { %v1589_v0 = vadd.f32 %v1587_v20, %v1585_v19 }
 0x202   : > { %1592 = vst.msk [vmem:[%s280_s6 + $0x8] sm:$0xff] %vm1590_vm6, %v1589_v0 }
 0x203 PF: > { %s15_s20 = sadd.s32 1, %s2025_s20   ;;  %s2419_s18 = smov %s2021_s19 }
 0x204   : > { %p12_p5 = scmp.ge.s32.totalorder %s15_s20, 4   ;;  %s2420_s19 = smov %s2422_s21 }
 0x206   :  { %14 = sbr.rel (!%p12_p5) target bundleno = 2 (0x2), region = 87 }

</bundles_post_ra>
